<compile_context>
chip_gen: v7x
topology: tpu7x:2x2x1
jax: 0.10.0
libtpu: 0.0.40
codegen_flags: <defaults>
</compile_context>

<pallas_src>
import jax
import jax.numpy as jnp
from jax import lax
from jax.experimental import pallas as pl
from jax.experimental.pallas import tpu as pltpu


# ---------------------------------------------------------------------------
# Fused Pallas kernel (entire forward pass, including the embedding gather)
# ---------------------------------------------------------------------------

def _make_fused_kernel(num_layers, T, B, H, vocab):
    H2 = 2 * H        # hidden width per timestep: [fwd | bwd]
    G = 8 * H         # 4 gates x 2 directions; column layout
                      # [i_f i_b | f_f f_b | g_f g_b | o_f o_b], each block H wide
    TB = T * B

    def sig(x):
        # one EUP op instead of the exp/div expansion (shorter serial EUP chain)
        return 0.5 * jnp.tanh(0.5 * x) + 0.5

    def kernel(*refs):
        ids_ref, emb_ref = refs[0], refs[1]                  # (TB,1) i32, (vocab, V)
        layer_refs = refs[2:2 + 3 * num_layers]
        w12_ref, bh_ref, cw_ref = refs[2 + 3 * num_layers:5 + 3 * num_layers]
        out_ref = refs[-2]                                   # (B, C)
        hseq = refs[-1]                                      # VMEM scratch (TB, H2)

        # ---- in-kernel embedding gather: one-hot matmul (no HBM round trip) ----
        ids = ids_ref[...]                                               # (TB, 1)
        vocab_iota = lax.broadcasted_iota(jnp.int32, (TB, vocab), 1)
        onehot = (ids == vocab_iota).astype(jnp.float32)                 # (TB, vocab)
        x = jnp.dot(onehot, emb_ref[...],
                    preferred_element_type=jnp.float32)                  # (TB, Din0)

        att_f = jnp.zeros((B, H), jnp.float32)   # chooseWeight-weighted fwd sum
        att_b = jnp.zeros((B, H), jnp.float32)   # chooseWeight-weighted bwd sum

        for l in range(num_layers):
            wih = layer_refs[3 * l + 0][...]    # (Din, 2G)
            whh = layer_refs[3 * l + 1][...]    # (H2, G) block-diagonal recurrent
            bias = layer_refs[3 * l + 2][...]   # (1, 2G)  full bias in [:, :G]
            is_last = (l == num_layers - 1)

            # Full-block read of hseq happens BEFORE any store of this layer
            # (read-after-write hazard guard for num_layers > 2).
            x_in = x if l == 0 else hseq[...]

            # Hoisted input projection: ONE well-filled (TB,Din)@(Din,2G) push.
            xw_all = jnp.dot(x_in, wih, preferred_element_type=jnp.float32) + bias

            # Pre-combined per-step pre-activations (off the serial path).
            # fwd direction at step s consumes abs time s; bwd consumes T-1-s.
            g_pre = [xw_all[s * B:(s + 1) * B, :G]
                     + xw_all[(T - 1 - s) * B:(T - s) * B, G:]
                     for s in range(T)]

            h = jnp.zeros((B, H2), jnp.float32)     # [h_fwd | h_bwd]
            c = jnp.zeros((B, H2), jnp.float32)
            for s in range(T):                      # fully unrolled recurrence
                gates = g_pre[s] + jnp.dot(h, whh,
                                           preferred_element_type=jnp.float32)
                i_g = sig(gates[:, 0 * H2:1 * H2])
                f_g = sig(gates[:, 1 * H2:2 * H2])
                g_g = jnp.tanh(gates[:, 2 * H2:3 * H2])
                o_g = sig(gates[:, 3 * H2:4 * H2])
                c = f_g * c + i_g * g_g
                h = o_g * jnp.tanh(c)
                if is_last:
                    # fuse the chooseWeight-weighted time sum into the recurrence
                    att_f = att_f + cw_ref[s] * h[:, 0:H]
                    att_b = att_b + cw_ref[T - 1 - s] * h[:, H:H2]
                else:
                    hseq[s * B:(s + 1) * B, 0:H] = h[:, 0:H]            # abs time s
                    hseq[(T - 1 - s) * B:(T - s) * B, H:H2] = h[:, H:H2]  # abs T-1-s

        # ---- folded head: att @ (W1@W2) + (sum cw)*(b1@W2) + b2 ----
        out_ref[...] = (jnp.dot(att_f, w12_ref[0:H, :],
                                preferred_element_type=jnp.float32)
                        + jnp.dot(att_b, w12_ref[H:H2, :],
                                  preferred_element_type=jnp.float32)
                        + bh_ref[...])

    return kernel


# ---------------------------------------------------------------------------
# One-time offline weight packing (NOT part of the per-call forward path)
# ---------------------------------------------------------------------------

def _pack_lstm_layer(layer, H):
    """Pack one bidirectional layer for the fused kernel.

    Returns:
      wih_cat  (Din, 2G): cols [:G] = fwd input weights at fwd gate columns,
                          cols [G:] = bwd input weights at bwd gate columns.
      whh      (2H,  G) : block-diagonal recurrent weight (rows [h_f | h_b]).
      bias_cat (1,  2G) : full (b_ih+b_hh) bias in cols [:G], zeros in cols [G:].
    Gate column order: [i_f i_b | f_f f_b | g_f g_b | o_f o_b], blocks of H.
    """
    wf, wb = layer["w_ih_f"], layer["w_ih_b"]     # (Din, 4H), gate cols [i f g o]
    hf, hb = layer["w_hh_f"], layer["w_hh_b"]     # (H, 4H)
    bf, bb = layer["b_f"], layer["b_b"]           # (1, 4H)
    d_in = wf.shape[0]
    G = 8 * H
    zin = jnp.zeros((d_in, H), jnp.float32)
    zh = jnp.zeros((H, H), jnp.float32)

    f_cols, b_cols, whh_cols, bias_cols = [], [], [], []
    for g in range(4):
        sl = slice(g * H, (g + 1) * H)
        f_cols += [wf[:, sl], zin]
        b_cols += [zin, wb[:, sl]]
        whh_cols += [jnp.concatenate([hf[:, sl], zh], axis=0),
                     jnp.concatenate([zh, hb[:, sl]], axis=0)]
        bias_cols += [bf[:, sl], bb[:, sl]]

    wih_cat = jnp.concatenate(f_cols + b_cols, axis=1)                   # (Din, 2G)
    whh = jnp.concatenate(whh_cols, axis=1)                              # (2H, G)
    bias_cat = jnp.concatenate(bias_cols + [jnp.zeros((1, G), jnp.float32)],
                               axis=1)                                   # (1, 2G)
    return wih_cat, whh, bias_cat


def pack_params(params):
    """Run ONCE at init: pack LSTM weights and fold the linear1/linear2 head."""
    H = params["lstm"][0]["w_hh_f"].shape[0]
    layers = [_pack_lstm_layer(layer, H) for layer in params["lstm"]]
    cw = params["choose_weight"].reshape(-1).astype(jnp.float32)          # (T,)
    # sum_t cw[t]*(h_t@W1 + b1) @ W2 + b2
    #   == (sum_t cw[t]*h_t) @ (W1@W2) + (sum_t cw[t])*(b1@W2) + b2
    w12 = (params["w1"] @ params["w2"]).astype(jnp.float32)               # (H2, C)
    b_head = (jnp.sum(cw) * (params["b1"] @ params["w2"])
              + params["b2"]).astype(jnp.float32)                         # (1, C)
    return {"embedding": params["embedding"].astype(jnp.float32),
            "layers": layers, "w12": w12, "b_head": b_head, "cw": cw}


# ---------------------------------------------------------------------------
# Forward pass (single pallas_call; everything stays resident in VMEM)
# ---------------------------------------------------------------------------

def nlp_net_forward(x_ids, packed):
    B, T = x_ids.shape
    emb = packed["embedding"]
    vocab = emb.shape[0]
    layers = packed["layers"]
    num_layers = len(layers)
    H2 = layers[0][1].shape[0]
    H = H2 // 2
    C = packed["w12"].shape[1]
    TB = T * B

    # time-major flattened ids: row s*B + b  <->  (time s, batch b)
    ids_tm = x_ids.T.reshape(TB, 1).astype(jnp.int32)

    layer_args = [a for triple in layers for a in triple]
    kernel = _make_fused_kernel(num_layers, T, B, H, vocab)

    def full(shape):
        shape = tuple(int(d) for d in shape)
        return pl.BlockSpec(shape, lambda i, _n=len(shape): (0,) * _n)

    in_specs = ([full(ids_tm.shape), full(emb.shape)]
                + [full(a.shape) for a in layer_args]
                + [full(packed["w12"].shape), full(packed["b_head"].shape),
                   pl.BlockSpec(memory_space=pltpu.MemorySpace.SMEM)])

    return pl.pallas_call(
        kernel,
        out_shape=jax.ShapeDtypeStruct((B, C), jnp.float32),
        grid=(1,),
        in_specs=in_specs,
        out_specs=full((B, C)),
        scratch_shapes=[pltpu.VMEM((TB, H2), jnp.float32)],
        compiler_params=pltpu.CompilerParams(
            dimension_semantics=("arbitrary",)),
    )(ids_tm, emb, *layer_args, packed["w12"], packed["b_head"], packed["cw"])


# ---------------------------------------------------------------------------
# Pure-JAX reference (PyTorch semantics) for correctness checking
# ---------------------------------------------------------------------------

def _ref_lstm_dir(x_tm, w_ih, w_hh, b):
    T, B, _ = x_tm.shape
    H = w_hh.shape[0]

    def step(carry, x_t):
        h, c = carry
        gates = x_t @ w_ih + h @ w_hh + b
        i = jax.nn.sigmoid(gates[:, :H])
        f = jax.nn.sigmoid(gates[:, H:2 * H])
        g = jnp.tanh(gates[:, 2 * H:3 * H])
        o = jax.nn.sigmoid(gates[:, 3 * H:])
        c = f * c + i * g
        h = o * jnp.tanh(c)
        return (h, c), h

    init = (jnp.zeros((B, H), jnp.float32), jnp.zeros((B, H), jnp.float32))
    _, hs = lax.scan(step, init, x_tm)
    return hs


def nlp_net_reference(x_ids, params):
    emb = jnp.take(params["embedding"], x_ids, axis=0)
    x_tm = jnp.transpose(emb, (1, 0, 2))
    for layer in params["lstm"]:
        h_f = _ref_lstm_dir(x_tm, layer["w_ih_f"], layer["w_hh_f"], layer["b_f"])
        h_b = jnp.flip(_ref_lstm_dir(jnp.flip(x_tm, axis=0),
                                     layer["w_ih_b"], layer["w_hh_b"], layer["b_b"]),
                       axis=0)
        x_tm = jnp.concatenate([h_f, h_b], axis=-1)
    lstm_out = jnp.transpose(x_tm, (1, 0, 2))                         # (B, T, hidden)
    out = lstm_out @ params["w1"] + params["b1"]                      # (B, T, V)
    att = jnp.sum(out * params["choose_weight"][None, :, :], axis=1)  # (B, V)
    return att @ params["w2"] + params["b2"]                          # (B, C)


# ---------------------------------------------------------------------------
# Deterministic parameter construction (synthetic, PyTorch-equivalent layout)
# ---------------------------------------------------------------------------

def make_params(key, vocab, V, hidden_size, num_layers, maxlength, category_cnt):
    H = hidden_size // 2
    keys = iter(jax.random.split(key, 64))

    def rnd(shape, scale=0.1):
        return (scale * jax.random.normal(next(keys), shape)).astype(jnp.float32)

    params = {
        "embedding": rnd((vocab, V), 1.0),     # id_to_vector
        "lstm": [],
        "w1": rnd((hidden_size, V)),           # linear1.weight.T
        "b1": rnd((1, V)),
        "choose_weight": rnd((maxlength, 1), 1.0),
        "w2": rnd((V, category_cnt)),          # linear2.weight.T
        "b2": rnd((1, category_cnt)),
    }
    d_in = V
    for _ in range(num_layers):
        layer = {}
        for d in ("f", "b"):
            layer[f"w_ih_{d}"] = rnd((d_in, 4 * H))   # weight_ih.T, gate cols [i f g o]
            layer[f"w_hh_{d}"] = rnd((H, 4 * H))      # weight_hh.T
            layer[f"b_{d}"] = rnd((1, 4 * H))         # b_ih + b_hh (combined)
        params["lstm"].append(layer)
        d_in = 2 * H                                  # bidirectional concat feeds next layer
    return params


# ---------------------------------------------------------------------------
# Main
# ---------------------------------------------------------------------------

if __name__ == "__main__":
    B = 2              # batch
    T = 8              # basic_param.MAXLENGTH (sequence length)
    VOCAB = 20         # rows of id_to_vector
    V = 32             # basic_param.V (embedding dim / inputSize)
    HIDDEN = 32        # basic_param.hidden_size (H per direction = 16)
    NUM_LAYERS = 2     # basic_param.num_layers
    CATEGORIES = 5     # basic_param.categoryCnt

    key = jax.random.PRNGKey(0)
    k_par, k_ids = jax.random.split(key)
    params = make_params(k_par, VOCAB, V, HIDDEN, NUM_LAYERS, T, CATEGORIES)
    x_ids = jax.random.randint(k_ids, (B, T), 0, VOCAB, dtype=jnp.int32)

    # one-time offline packing + head folding (outside the forward path)
    packed = jax.tree_util.tree_map(jax.block_until_ready, pack_params(params))

    forward = jax.jit(nlp_net_forward)
    logits = jax.block_until_ready(forward(x_ids, packed))
    ref = jax.block_until_ready(nlp_net_reference(x_ids, params))

    assert logits.shape == (B, CATEGORIES)
    assert jnp.allclose(logits, ref, atol=1e-3, rtol=1e-3), (
        f"mismatch: max abs err {jnp.max(jnp.abs(logits - ref))}")

    print("KERNEL_OK")
</pallas_src>

<mosaic_0001>
module attributes {stable_mosaic.version = 11 : i64} {
  func.func @kernel(%arg0: i32, %arg1: memref<16x1xi32, #tpu.memory_space<vmem>>, %arg2: memref<20x32xf32, #tpu.memory_space<vmem>>, %arg3: memref<32x256xf32, #tpu.memory_space<vmem>>, %arg4: memref<32x128xf32, #tpu.memory_space<vmem>>, %arg5: memref<1x256xf32, #tpu.memory_space<vmem>>, %arg6: memref<32x256xf32, #tpu.memory_space<vmem>>, %arg7: memref<32x128xf32, #tpu.memory_space<vmem>>, %arg8: memref<1x256xf32, #tpu.memory_space<vmem>>, %arg9: memref<32x5xf32, #tpu.memory_space<vmem>>, %arg10: memref<1x5xf32, #tpu.memory_space<vmem>>, %arg11: memref<8xf32, #tpu.memory_space<smem>>, %arg12: memref<2x5xf32, #tpu.memory_space<vmem>>, %arg13: memref<16x32xf32, #tpu.memory_space<vmem>>) attributes {dimension_semantics = [#tpu.dimension_semantics<arbitrary>], iteration_bounds = array<i64: 1>, scalar_prefetch = 0 : i64, scratch_operands = 1 : i64, tpu.core_type = #tpu.core_type<tc>, window_params = [{pipeline_mode = #tpu.pipeline_mode<synchronous>, transform_indices = @transform_0, window_bounds = array<i64: 16, 1>}, {pipeline_mode = #tpu.pipeline_mode<synchronous>, transform_indices = @transform_1, window_bounds = array<i64: 20, 32>}, {pipeline_mode = #tpu.pipeline_mode<synchronous>, transform_indices = @transform_2, window_bounds = array<i64: 32, 256>}, {pipeline_mode = #tpu.pipeline_mode<synchronous>, transform_indices = @transform_3, window_bounds = array<i64: 32, 128>}, {pipeline_mode = #tpu.pipeline_mode<synchronous>, transform_indices = @transform_4, window_bounds = array<i64: 1, 256>}, {pipeline_mode = #tpu.pipeline_mode<synchronous>, transform_indices = @transform_5, window_bounds = array<i64: 32, 256>}, {pipeline_mode = #tpu.pipeline_mode<synchronous>, transform_indices = @transform_6, window_bounds = array<i64: 32, 128>}, {pipeline_mode = #tpu.pipeline_mode<synchronous>, transform_indices = @transform_7, window_bounds = array<i64: 1, 256>}, {pipeline_mode = #tpu.pipeline_mode<synchronous>, transform_indices = @transform_8, window_bounds = array<i64: 32, 5>}, {pipeline_mode = #tpu.pipeline_mode<synchronous>, transform_indices = @transform_9, window_bounds = array<i64: 1, 5>}, {transform_indices = @transform_10, window_bounds = array<i64: 8>}, {pipeline_mode = #tpu.pipeline_mode<synchronous>, transform_indices = @transform_11, window_bounds = array<i64: 2, 5>}]} {
    %c0 = arith.constant 0 : index
    %c0_0 = arith.constant 0 : index
    %0 = vector.load %arg1[%c0, %c0_0] : memref<16x1xi32, #tpu.memory_space<vmem>>, vector<16x1xi32>
    %1 = tpu.iota {dimensions = array<i32: 1>} : vector<16x20xi32>
    %2 = vector.broadcast %0 : vector<16x1xi32> to vector<16x20xi32>
    %3 = arith.cmpi eq, %2, %1 : vector<16x20xi32>
    %4 = arith.extui %3 : vector<16x20xi1> to vector<16x20xi32>
    %5 = arith.sitofp %4 : vector<16x20xi32> to vector<16x20xf32>
    %c0_1 = arith.constant 0 : index
    %c0_2 = arith.constant 0 : index
    %6 = vector.load %arg2[%c0_1, %c0_2] : memref<20x32xf32, #tpu.memory_space<vmem>>, vector<20x32xf32>
    %cst = arith.constant dense<0.000000e+00> : vector<16x32xf32>
    %7 = tpu.matmul %5, %6, %cst {dimension_numbers = #tpu.dot_dimension_numbers<[1], [0], [0], [1], [0, 0, 1, 1], [], []>} : vector<16x20xf32>, vector<20x32xf32>, vector<16x32xf32> -> vector<16x32xf32>
    %cst_3 = arith.constant 0.000000e+00 : f32
    %8 = vector.broadcast %cst_3 : f32 to vector<2x16xf32>
    %cst_4 = arith.constant 0.000000e+00 : f32
    %9 = vector.broadcast %cst_4 : f32 to vector<2x16xf32>
    %c0_5 = arith.constant 0 : index
    %c0_6 = arith.constant 0 : index
    %10 = vector.load %arg3[%c0_5, %c0_6] : memref<32x256xf32, #tpu.memory_space<vmem>>, vector<32x256xf32>
    %c0_7 = arith.constant 0 : index
    %c0_8 = arith.constant 0 : index
    %11 = vector.load %arg4[%c0_7, %c0_8] : memref<32x128xf32, #tpu.memory_space<vmem>>, vector<32x128xf32>
    %c0_9 = arith.constant 0 : index
    %c0_10 = arith.constant 0 : index
    %12 = vector.load %arg5[%c0_9, %c0_10] : memref<1x256xf32, #tpu.memory_space<vmem>>, vector<1x256xf32>
    %cst_11 = arith.constant dense<0.000000e+00> : vector<16x256xf32>
    %13 = tpu.matmul %7, %10, %cst_11 {dimension_numbers = #tpu.dot_dimension_numbers<[1], [0], [0], [1], [0, 0, 1, 1], [], []>} : vector<16x32xf32>, vector<32x256xf32>, vector<16x256xf32> -> vector<16x256xf32>
    %14 = vector.broadcast %12 : vector<1x256xf32> to vector<16x256xf32>
    %15 = arith.addf %13, %14 : vector<16x256xf32>
    %16 = vector.extract_strided_slice %15 {offsets = [0, 0], sizes = [2, 128], strides = [1, 1]} : vector<16x256xf32> to vector<2x128xf32>
    %17 = vector.extract_strided_slice %15 {offsets = [14, 128], sizes = [2, 128], strides = [1, 1]} : vector<16x256xf32> to vector<2x128xf32>
    %18 = arith.addf %16, %17 : vector<2x128xf32>
    %19 = vector.extract_strided_slice %15 {offsets = [2, 0], sizes = [2, 128], strides = [1, 1]} : vector<16x256xf32> to vector<2x128xf32>
    %20 = vector.extract_strided_slice %15 {offsets = [12, 128], sizes = [2, 128], strides = [1, 1]} : vector<16x256xf32> to vector<2x128xf32>
    %21 = arith.addf %19, %20 : vector<2x128xf32>
    %22 = vector.extract_strided_slice %15 {offsets = [4, 0], sizes = [2, 128], strides = [1, 1]} : vector<16x256xf32> to vector<2x128xf32>
    %23 = vector.extract_strided_slice %15 {offsets = [10, 128], sizes = [2, 128], strides = [1, 1]} : vector<16x256xf32> to vector<2x128xf32>
    %24 = arith.addf %22, %23 : vector<2x128xf32>
    %25 = vector.extract_strided_slice %15 {offsets = [6, 0], sizes = [2, 128], strides = [1, 1]} : vector<16x256xf32> to vector<2x128xf32>
    %26 = vector.extract_strided_slice %15 {offsets = [8, 128], sizes = [2, 128], strides = [1, 1]} : vector<16x256xf32> to vector<2x128xf32>
    %27 = arith.addf %25, %26 : vector<2x128xf32>
    %28 = vector.extract_strided_slice %15 {offsets = [8, 0], sizes = [2, 128], strides = [1, 1]} : vector<16x256xf32> to vector<2x128xf32>
    %29 = vector.extract_strided_slice %15 {offsets = [6, 128], sizes = [2, 128], strides = [1, 1]} : vector<16x256xf32> to vector<2x128xf32>
    %30 = arith.addf %28, %29 : vector<2x128xf32>
    %31 = vector.extract_strided_slice %15 {offsets = [10, 0], sizes = [2, 128], strides = [1, 1]} : vector<16x256xf32> to vector<2x128xf32>
    %32 = vector.extract_strided_slice %15 {offsets = [4, 128], sizes = [2, 128], strides = [1, 1]} : vector<16x256xf32> to vector<2x128xf32>
    %33 = arith.addf %31, %32 : vector<2x128xf32>
    %34 = vector.extract_strided_slice %15 {offsets = [12, 0], sizes = [2, 128], strides = [1, 1]} : vector<16x256xf32> to vector<2x128xf32>
    %35 = vector.extract_strided_slice %15 {offsets = [2, 128], sizes = [2, 128], strides = [1, 1]} : vector<16x256xf32> to vector<2x128xf32>
    %36 = arith.addf %34, %35 : vector<2x128xf32>
    %37 = vector.extract_strided_slice %15 {offsets = [14, 0], sizes = [2, 128], strides = [1, 1]} : vector<16x256xf32> to vector<2x128xf32>
    %38 = vector.extract_strided_slice %15 {offsets = [0, 128], sizes = [2, 128], strides = [1, 1]} : vector<16x256xf32> to vector<2x128xf32>
    %39 = arith.addf %37, %38 : vector<2x128xf32>
    %cst_12 = arith.constant 0.000000e+00 : f32
    %40 = vector.broadcast %cst_12 : f32 to vector<2x32xf32>
    %cst_13 = arith.constant 0.000000e+00 : f32
    %41 = vector.broadcast %cst_13 : f32 to vector<2x32xf32>
    %cst_14 = arith.constant dense<0.000000e+00> : vector<2x128xf32>
    %42 = tpu.matmul %40, %11, %cst_14 {dimension_numbers = #tpu.dot_dimension_numbers<[1], [0], [0], [1], [0, 0, 1, 1], [], []>} : vector<2x32xf32>, vector<32x128xf32>, vector<2x128xf32> -> vector<2x128xf32>
    %43 = arith.addf %18, %42 : vector<2x128xf32>
    %44 = vector.extract_strided_slice %43 {offsets = [0, 0], sizes = [2, 32], strides = [1, 1]} : vector<2x128xf32> to vector<2x32xf32>
    %cst_15 = arith.constant 5.000000e-01 : f32
    %45 = vector.broadcast %cst_15 : f32 to vector<2x32xf32>
    %46 = arith.mulf %45, %44 : vector<2x32xf32>
    %47 = math.tanh %46 : vector<2x32xf32>
    %cst_16 = arith.constant 5.000000e-01 : f32
    %48 = vector.broadcast %cst_16 : f32 to vector<2x32xf32>
    %49 = arith.mulf %48, %47 : vector<2x32xf32>
    %cst_17 = arith.constant 5.000000e-01 : f32
    %50 = vector.broadcast %cst_17 : f32 to vector<2x32xf32>
    %51 = arith.addf %49, %50 : vector<2x32xf32>
    %52 = vector.extract_strided_slice %43 {offsets = [0, 32], sizes = [2, 32], strides = [1, 1]} : vector<2x128xf32> to vector<2x32xf32>
    %cst_18 = arith.constant 5.000000e-01 : f32
    %53 = vector.broadcast %cst_18 : f32 to vector<2x32xf32>
    %54 = arith.mulf %53, %52 : vector<2x32xf32>
    %55 = math.tanh %54 : vector<2x32xf32>
    %cst_19 = arith.constant 5.000000e-01 : f32
    %56 = vector.broadcast %cst_19 : f32 to vector<2x32xf32>
    %57 = arith.mulf %56, %55 : vector<2x32xf32>
    %cst_20 = arith.constant 5.000000e-01 : f32
    %58 = vector.broadcast %cst_20 : f32 to vector<2x32xf32>
    %59 = arith.addf %57, %58 : vector<2x32xf32>
    %60 = vector.extract_strided_slice %43 {offsets = [0, 64], sizes = [2, 32], strides = [1, 1]} : vector<2x128xf32> to vector<2x32xf32>
    %61 = math.tanh %60 : vector<2x32xf32>
    %62 = vector.extract_strided_slice %43 {offsets = [0, 96], sizes = [2, 32], strides = [1, 1]} : vector<2x128xf32> to vector<2x32xf32>
    %cst_21 = arith.constant 5.000000e-01 : f32
    %63 = vector.broadcast %cst_21 : f32 to vector<2x32xf32>
    %64 = arith.mulf %63, %62 : vector<2x32xf32>
    %65 = math.tanh %64 : vector<2x32xf32>
    %cst_22 = arith.constant 5.000000e-01 : f32
    %66 = vector.broadcast %cst_22 : f32 to vector<2x32xf32>
    %67 = arith.mulf %66, %65 : vector<2x32xf32>
    %cst_23 = arith.constant 5.000000e-01 : f32
    %68 = vector.broadcast %cst_23 : f32 to vector<2x32xf32>
    %69 = arith.addf %67, %68 : vector<2x32xf32>
    %70 = arith.mulf %59, %41 : vector<2x32xf32>
    %71 = arith.mulf %51, %61 : vector<2x32xf32>
    %72 = arith.addf %70, %71 : vector<2x32xf32>
    %73 = math.tanh %72 : vector<2x32xf32>
    %74 = arith.mulf %69, %73 : vector<2x32xf32>
    %75 = vector.extract_strided_slice %74 {offsets = [0, 0], sizes = [2, 16], strides = [1, 1]} : vector<2x32xf32> to vector<2x16xf32>
    %c0_24 = arith.constant 0 : index
    %c0_25 = arith.constant 0 : index
    %76 = vector.load %arg13[%c0_24, %c0_25] : memref<16x32xf32, #tpu.memory_space<vmem>>, vector<2x16xf32>
    tpu.vector_store %arg13[%c0_24, %c0_25], %75 {strides = array<i32>} : memref<16x32xf32, #tpu.memory_space<vmem>>, vector<2x16xf32>,
    %77 = vector.extract_strided_slice %74 {offsets = [0, 16], sizes = [2, 16], strides = [1, 1]} : vector<2x32xf32> to vector<2x16xf32>
    %c14 = arith.constant 14 : index
    %c16 = arith.constant 16 : index
    %78 = vector.load %arg13[%c14, %c16] : memref<16x32xf32, #tpu.memory_space<vmem>>, vector<2x16xf32>
    tpu.vector_store %arg13[%c14, %c16], %77 {strides = array<i32>} : memref<16x32xf32, #tpu.memory_space<vmem>>, vector<2x16xf32>,
    %cst_26 = arith.constant dense<0.000000e+00> : vector<2x128xf32>
    %79 = tpu.matmul %74, %11, %cst_26 {dimension_numbers = #tpu.dot_dimension_numbers<[1], [0], [0], [1], [0, 0, 1, 1], [], []>} : vector<2x32xf32>, vector<32x128xf32>, vector<2x128xf32> -> vector<2x128xf32>
    %80 = arith.addf %21, %79 : vector<2x128xf32>
    %81 = vector.extract_strided_slice %80 {offsets = [0, 0], sizes = [2, 32], strides = [1, 1]} : vector<2x128xf32> to vector<2x32xf32>
    %cst_27 = arith.constant 5.000000e-01 : f32
    %82 = vector.broadcast %cst_27 : f32 to vector<2x32xf32>
    %83 = arith.mulf %82, %81 : vector<2x32xf32>
    %84 = math.tanh %83 : vector<2x32xf32>
    %cst_28 = arith.constant 5.000000e-01 : f32
    %85 = vector.broadcast %cst_28 : f32 to vector<2x32xf32>
    %86 = arith.mulf %85, %84 : vector<2x32xf32>
    %cst_29 = arith.constant 5.000000e-01 : f32
    %87 = vector.broadcast %cst_29 : f32 to vector<2x32xf32>
    %88 = arith.addf %86, %87 : vector<2x32xf32>
    %89 = vector.extract_strided_slice %80 {offsets = [0, 32], sizes = [2, 32], strides = [1, 1]} : vector<2x128xf32> to vector<2x32xf32>
    %cst_30 = arith.constant 5.000000e-01 : f32
    %90 = vector.broadcast %cst_30 : f32 to vector<2x32xf32>
    %91 = arith.mulf %90, %89 : vector<2x32xf32>
    %92 = math.tanh %91 : vector<2x32xf32>
    %cst_31 = arith.constant 5.000000e-01 : f32
    %93 = vector.broadcast %cst_31 : f32 to vector<2x32xf32>
    %94 = arith.mulf %93, %92 : vector<2x32xf32>
    %cst_32 = arith.constant 5.000000e-01 : f32
    %95 = vector.broadcast %cst_32 : f32 to vector<2x32xf32>
    %96 = arith.addf %94, %95 : vector<2x32xf32>
    %97 = vector.extract_strided_slice %80 {offsets = [0, 64], sizes = [2, 32], strides = [1, 1]} : vector<2x128xf32> to vector<2x32xf32>
    %98 = math.tanh %97 : vector<2x32xf32>
    %99 = vector.extract_strided_slice %80 {offsets = [0, 96], sizes = [2, 32], strides = [1, 1]} : vector<2x128xf32> to vector<2x32xf32>
    %cst_33 = arith.constant 5.000000e-01 : f32
    %100 = vector.broadcast %cst_33 : f32 to vector<2x32xf32>
    %101 = arith.mulf %100, %99 : vector<2x32xf32>
    %102 = math.tanh %101 : vector<2x32xf32>
    %cst_34 = arith.constant 5.000000e-01 : f32
    %103 = vector.broadcast %cst_34 : f32 to vector<2x32xf32>
    %104 = arith.mulf %103, %102 : vector<2x32xf32>
    %cst_35 = arith.constant 5.000000e-01 : f32
    %105 = vector.broadcast %cst_35 : f32 to vector<2x32xf32>
    %106 = arith.addf %104, %105 : vector<2x32xf32>
    %107 = arith.mulf %96, %72 : vector<2x32xf32>
    %108 = arith.mulf %88, %98 : vector<2x32xf32>
    %109 = arith.addf %107, %108 : vector<2x32xf32>
    %110 = math.tanh %109 : vector<2x32xf32>
    %111 = arith.mulf %106, %110 : vector<2x32xf32>
    %112 = vector.extract_strided_slice %111 {offsets = [0, 0], sizes = [2, 16], strides = [1, 1]} : vector<2x32xf32> to vector<2x16xf32>
    %c2 = arith.constant 2 : index
    %c0_36 = arith.constant 0 : index
    %113 = vector.load %arg13[%c2, %c0_36] : memref<16x32xf32, #tpu.memory_space<vmem>>, vector<2x16xf32>
    tpu.vector_store %arg13[%c2, %c0_36], %112 {strides = array<i32>} : memref<16x32xf32, #tpu.memory_space<vmem>>, vector<2x16xf32>,
    %114 = vector.extract_strided_slice %111 {offsets = [0, 16], sizes = [2, 16], strides = [1, 1]} : vector<2x32xf32> to vector<2x16xf32>
    %c12 = arith.constant 12 : index
    %c16_37 = arith.constant 16 : index
    %115 = vector.load %arg13[%c12, %c16_37] : memref<16x32xf32, #tpu.memory_space<vmem>>, vector<2x16xf32>
    tpu.vector_store %arg13[%c12, %c16_37], %114 {strides = array<i32>} : memref<16x32xf32, #tpu.memory_space<vmem>>, vector<2x16xf32>,
    %cst_38 = arith.constant dense<0.000000e+00> : vector<2x128xf32>
    %116 = tpu.matmul %111, %11, %cst_38 {dimension_numbers = #tpu.dot_dimension_numbers<[1], [0], [0], [1], [0, 0, 1, 1], [], []>} : vector<2x32xf32>, vector<32x128xf32>, vector<2x128xf32> -> vector<2x128xf32>
    %117 = arith.addf %24, %116 : vector<2x128xf32>
    %118 = vector.extract_strided_slice %117 {offsets = [0, 0], sizes = [2, 32], strides = [1, 1]} : vector<2x128xf32> to vector<2x32xf32>
    %cst_39 = arith.constant 5.000000e-01 : f32
    %119 = vector.broadcast %cst_39 : f32 to vector<2x32xf32>
    %120 = arith.mulf %119, %118 : vector<2x32xf32>
    %121 = math.tanh %120 : vector<2x32xf32>
    %cst_40 = arith.constant 5.000000e-01 : f32
    %122 = vector.broadcast %cst_40 : f32 to vector<2x32xf32>
    %123 = arith.mulf %122, %121 : vector<2x32xf32>
    %cst_41 = arith.constant 5.000000e-01 : f32
    %124 = vector.broadcast %cst_41 : f32 to vector<2x32xf32>
    %125 = arith.addf %123, %124 : vector<2x32xf32>
    %126 = vector.extract_strided_slice %117 {offsets = [0, 32], sizes = [2, 32], strides = [1, 1]} : vector<2x128xf32> to vector<2x32xf32>
    %cst_42 = arith.constant 5.000000e-01 : f32
    %127 = vector.broadcast %cst_42 : f32 to vector<2x32xf32>
    %128 = arith.mulf %127, %126 : vector<2x32xf32>
    %129 = math.tanh %128 : vector<2x32xf32>
    %cst_43 = arith.constant 5.000000e-01 : f32
    %130 = vector.broadcast %cst_43 : f32 to vector<2x32xf32>
    %131 = arith.mulf %130, %129 : vector<2x32xf32>
    %cst_44 = arith.constant 5.000000e-01 : f32
    %132 = vector.broadcast %cst_44 : f32 to vector<2x32xf32>
    %133 = arith.addf %131, %132 : vector<2x32xf32>
    %134 = vector.extract_strided_slice %117 {offsets = [0, 64], sizes = [2, 32], strides = [1, 1]} : vector<2x128xf32> to vector<2x32xf32>
    %135 = math.tanh %134 : vector<2x32xf32>
    %136 = vector.extract_strided_slice %117 {offsets = [0, 96], sizes = [2, 32], strides = [1, 1]} : vector<2x128xf32> to vector<2x32xf32>
    %cst_45 = arith.constant 5.000000e-01 : f32
    %137 = vector.broadcast %cst_45 : f32 to vector<2x32xf32>
    %138 = arith.mulf %137, %136 : vector<2x32xf32>
    %139 = math.tanh %138 : vector<2x32xf32>
    %cst_46 = arith.constant 5.000000e-01 : f32
    %140 = vector.broadcast %cst_46 : f32 to vector<2x32xf32>
    %141 = arith.mulf %140, %139 : vector<2x32xf32>
    %cst_47 = arith.constant 5.000000e-01 : f32
    %142 = vector.broadcast %cst_47 : f32 to vector<2x32xf32>
    %143 = arith.addf %141, %142 : vector<2x32xf32>
    %144 = arith.mulf %133, %109 : vector<2x32xf32>
    %145 = arith.mulf %125, %135 : vector<2x32xf32>
    %146 = arith.addf %144, %145 : vector<2x32xf32>
    %147 = math.tanh %146 : vector<2x32xf32>
    %148 = arith.mulf %143, %147 : vector<2x32xf32>
    %149 = vector.extract_strided_slice %148 {offsets = [0, 0], sizes = [2, 16], strides = [1, 1]} : vector<2x32xf32> to vector<2x16xf32>
    %c4 = arith.constant 4 : index
    %c0_48 = arith.constant 0 : index
    %150 = vector.load %arg13[%c4, %c0_48] : memref<16x32xf32, #tpu.memory_space<vmem>>, vector<2x16xf32>
    tpu.vector_store %arg13[%c4, %c0_48], %149 {strides = array<i32>} : memref<16x32xf32, #tpu.memory_space<vmem>>, vector<2x16xf32>,
    %151 = vector.extract_strided_slice %148 {offsets = [0, 16], sizes = [2, 16], strides = [1, 1]} : vector<2x32xf32> to vector<2x16xf32>
    %c10 = arith.constant 10 : index
    %c16_49 = arith.constant 16 : index
    %152 = vector.load %arg13[%c10, %c16_49] : memref<16x32xf32, #tpu.memory_space<vmem>>, vector<2x16xf32>
    tpu.vector_store %arg13[%c10, %c16_49], %151 {strides = array<i32>} : memref<16x32xf32, #tpu.memory_space<vmem>>, vector<2x16xf32>,
    %cst_50 = arith.constant dense<0.000000e+00> : vector<2x128xf32>
    %153 = tpu.matmul %148, %11, %cst_50 {dimension_numbers = #tpu.dot_dimension_numbers<[1], [0], [0], [1], [0, 0, 1, 1], [], []>} : vector<2x32xf32>, vector<32x128xf32>, vector<2x128xf32> -> vector<2x128xf32>
    %154 = arith.addf %27, %153 : vector<2x128xf32>
    %155 = vector.extract_strided_slice %154 {offsets = [0, 0], sizes = [2, 32], strides = [1, 1]} : vector<2x128xf32> to vector<2x32xf32>
    %cst_51 = arith.constant 5.000000e-01 : f32
    %156 = vector.broadcast %cst_51 : f32 to vector<2x32xf32>
    %157 = arith.mulf %156, %155 : vector<2x32xf32>
    %158 = math.tanh %157 : vector<2x32xf32>
    %cst_52 = arith.constant 5.000000e-01 : f32
    %159 = vector.broadcast %cst_52 : f32 to vector<2x32xf32>
    %160 = arith.mulf %159, %158 : vector<2x32xf32>
    %cst_53 = arith.constant 5.000000e-01 : f32
    %161 = vector.broadcast %cst_53 : f32 to vector<2x32xf32>
    %162 = arith.addf %160, %161 : vector<2x32xf32>
    %163 = vector.extract_strided_slice %154 {offsets = [0, 32], sizes = [2, 32], strides = [1, 1]} : vector<2x128xf32> to vector<2x32xf32>
    %cst_54 = arith.constant 5.000000e-01 : f32
    %164 = vector.broadcast %cst_54 : f32 to vector<2x32xf32>
    %165 = arith.mulf %164, %163 : vector<2x32xf32>
    %166 = math.tanh %165 : vector<2x32xf32>
    %cst_55 = arith.constant 5.000000e-01 : f32
    %167 = vector.broadcast %cst_55 : f32 to vector<2x32xf32>
    %168 = arith.mulf %167, %166 : vector<2x32xf32>
    %cst_56 = arith.constant 5.000000e-01 : f32
    %169 = vector.broadcast %cst_56 : f32 to vector<2x32xf32>
    %170 = arith.addf %168, %169 : vector<2x32xf32>
    %171 = vector.extract_strided_slice %154 {offsets = [0, 64], sizes = [2, 32], strides = [1, 1]} : vector<2x128xf32> to vector<2x32xf32>
    %172 = math.tanh %171 : vector<2x32xf32>
    %173 = vector.extract_strided_slice %154 {offsets = [0, 96], sizes = [2, 32], strides = [1, 1]} : vector<2x128xf32> to vector<2x32xf32>
    %cst_57 = arith.constant 5.000000e-01 : f32
    %174 = vector.broadcast %cst_57 : f32 to vector<2x32xf32>
    %175 = arith.mulf %174, %173 : vector<2x32xf32>
    %176 = math.tanh %175 : vector<2x32xf32>
    %cst_58 = arith.constant 5.000000e-01 : f32
    %177 = vector.broadcast %cst_58 : f32 to vector<2x32xf32>
    %178 = arith.mulf %177, %176 : vector<2x32xf32>
    %cst_59 = arith.constant 5.000000e-01 : f32
    %179 = vector.broadcast %cst_59 : f32 to vector<2x32xf32>
    %180 = arith.addf %178, %179 : vector<2x32xf32>
    %181 = arith.mulf %170, %146 : vector<2x32xf32>
    %182 = arith.mulf %162, %172 : vector<2x32xf32>
    %183 = arith.addf %181, %182 : vector<2x32xf32>
    %184 = math.tanh %183 : vector<2x32xf32>
    %185 = arith.mulf %180, %184 : vector<2x32xf32>
    %186 = vector.extract_strided_slice %185 {offsets = [0, 0], sizes = [2, 16], strides = [1, 1]} : vector<2x32xf32> to vector<2x16xf32>
    %c6 = arith.constant 6 : index
    %c0_60 = arith.constant 0 : index
    %187 = vector.load %arg13[%c6, %c0_60] : memref<16x32xf32, #tpu.memory_space<vmem>>, vector<2x16xf32>
    tpu.vector_store %arg13[%c6, %c0_60], %186 {strides = array<i32>} : memref<16x32xf32, #tpu.memory_space<vmem>>, vector<2x16xf32>,
    %188 = vector.extract_strided_slice %185 {offsets = [0, 16], sizes = [2, 16], strides = [1, 1]} : vector<2x32xf32> to vector<2x16xf32>
    %c8 = arith.constant 8 : index
    %c16_61 = arith.constant 16 : index
    %189 = vector.load %arg13[%c8, %c16_61] : memref<16x32xf32, #tpu.memory_space<vmem>>, vector<2x16xf32>
    tpu.vector_store %arg13[%c8, %c16_61], %188 {strides = array<i32>} : memref<16x32xf32, #tpu.memory_space<vmem>>, vector<2x16xf32>,
    %cst_62 = arith.constant dense<0.000000e+00> : vector<2x128xf32>
    %190 = tpu.matmul %185, %11, %cst_62 {dimension_numbers = #tpu.dot_dimension_numbers<[1], [0], [0], [1], [0, 0, 1, 1], [], []>} : vector<2x32xf32>, vector<32x128xf32>, vector<2x128xf32> -> vector<2x128xf32>
    %191 = arith.addf %30, %190 : vector<2x128xf32>
    %192 = vector.extract_strided_slice %191 {offsets = [0, 0], sizes = [2, 32], strides = [1, 1]} : vector<2x128xf32> to vector<2x32xf32>
    %cst_63 = arith.constant 5.000000e-01 : f32
    %193 = vector.broadcast %cst_63 : f32 to vector<2x32xf32>
    %194 = arith.mulf %193, %192 : vector<2x32xf32>
    %195 = math.tanh %194 : vector<2x32xf32>
    %cst_64 = arith.constant 5.000000e-01 : f32
    %196 = vector.broadcast %cst_64 : f32 to vector<2x32xf32>
    %197 = arith.mulf %196, %195 : vector<2x32xf32>
    %cst_65 = arith.constant 5.000000e-01 : f32
    %198 = vector.broadcast %cst_65 : f32 to vector<2x32xf32>
    %199 = arith.addf %197, %198 : vector<2x32xf32>
    %200 = vector.extract_strided_slice %191 {offsets = [0, 32], sizes = [2, 32], strides = [1, 1]} : vector<2x128xf32> to vector<2x32xf32>
    %cst_66 = arith.constant 5.000000e-01 : f32
    %201 = vector.broadcast %cst_66 : f32 to vector<2x32xf32>
    %202 = arith.mulf %201, %200 : vector<2x32xf32>
    %203 = math.tanh %202 : vector<2x32xf32>
    %cst_67 = arith.constant 5.000000e-01 : f32
    %204 = vector.broadcast %cst_67 : f32 to vector<2x32xf32>
    %205 = arith.mulf %204, %203 : vector<2x32xf32>
    %cst_68 = arith.constant 5.000000e-01 : f32
    %206 = vector.broadcast %cst_68 : f32 to vector<2x32xf32>
    %207 = arith.addf %205, %206 : vector<2x32xf32>
    %208 = vector.extract_strided_slice %191 {offsets = [0, 64], sizes = [2, 32], strides = [1, 1]} : vector<2x128xf32> to vector<2x32xf32>
    %209 = math.tanh %208 : vector<2x32xf32>
    %210 = vector.extract_strided_slice %191 {offsets = [0, 96], sizes = [2, 32], strides = [1, 1]} : vector<2x128xf32> to vector<2x32xf32>
    %cst_69 = arith.constant 5.000000e-01 : f32
    %211 = vector.broadcast %cst_69 : f32 to vector<2x32xf32>
    %212 = arith.mulf %211, %210 : vector<2x32xf32>
    %213 = math.tanh %212 : vector<2x32xf32>
    %cst_70 = arith.constant 5.000000e-01 : f32
    %214 = vector.broadcast %cst_70 : f32 to vector<2x32xf32>
    %215 = arith.mulf %214, %213 : vector<2x32xf32>
    %cst_71 = arith.constant 5.000000e-01 : f32
    %216 = vector.broadcast %cst_71 : f32 to vector<2x32xf32>
    %217 = arith.addf %215, %216 : vector<2x32xf32>
    %218 = arith.mulf %207, %183 : vector<2x32xf32>
    %219 = arith.mulf %199, %209 : vector<2x32xf32>
    %220 = arith.addf %218, %219 : vector<2x32xf32>
    %221 = math.tanh %220 : vector<2x32xf32>
    %222 = arith.mulf %217, %221 : vector<2x32xf32>
    %223 = vector.extract_strided_slice %222 {offsets = [0, 0], sizes = [2, 16], strides = [1, 1]} : vector<2x32xf32> to vector<2x16xf32>
    %c8_72 = arith.constant 8 : index
    %c0_73 = arith.constant 0 : index
    %224 = vector.load %arg13[%c8_72, %c0_73] : memref<16x32xf32, #tpu.memory_space<vmem>>, vector<2x16xf32>
    tpu.vector_store %arg13[%c8_72, %c0_73], %223 {strides = array<i32>} : memref<16x32xf32, #tpu.memory_space<vmem>>, vector<2x16xf32>,
    %225 = vector.extract_strided_slice %222 {offsets = [0, 16], sizes = [2, 16], strides = [1, 1]} : vector<2x32xf32> to vector<2x16xf32>
    %c6_74 = arith.constant 6 : index
    %c16_75 = arith.constant 16 : index
    %226 = vector.load %arg13[%c6_74, %c16_75] : memref<16x32xf32, #tpu.memory_space<vmem>>, vector<2x16xf32>
    tpu.vector_store %arg13[%c6_74, %c16_75], %225 {strides = array<i32>} : memref<16x32xf32, #tpu.memory_space<vmem>>, vector<2x16xf32>,
    %cst_76 = arith.constant dense<0.000000e+00> : vector<2x128xf32>
    %227 = tpu.matmul %222, %11, %cst_76 {dimension_numbers = #tpu.dot_dimension_numbers<[1], [0], [0], [1], [0, 0, 1, 1], [], []>} : vector<2x32xf32>, vector<32x128xf32>, vector<2x128xf32> -> vector<2x128xf32>
    %228 = arith.addf %33, %227 : vector<2x128xf32>
    %229 = vector.extract_strided_slice %228 {offsets = [0, 0], sizes = [2, 32], strides = [1, 1]} : vector<2x128xf32> to vector<2x32xf32>
    %cst_77 = arith.constant 5.000000e-01 : f32
    %230 = vector.broadcast %cst_77 : f32 to vector<2x32xf32>
    %231 = arith.mulf %230, %229 : vector<2x32xf32>
    %232 = math.tanh %231 : vector<2x32xf32>
    %cst_78 = arith.constant 5.000000e-01 : f32
    %233 = vector.broadcast %cst_78 : f32 to vector<2x32xf32>
    %234 = arith.mulf %233, %232 : vector<2x32xf32>
    %cst_79 = arith.constant 5.000000e-01 : f32
    %235 = vector.broadcast %cst_79 : f32 to vector<2x32xf32>
    %236 = arith.addf %234, %235 : vector<2x32xf32>
    %237 = vector.extract_strided_slice %228 {offsets = [0, 32], sizes = [2, 32], strides = [1, 1]} : vector<2x128xf32> to vector<2x32xf32>
    %cst_80 = arith.constant 5.000000e-01 : f32
    %238 = vector.broadcast %cst_80 : f32 to vector<2x32xf32>
    %239 = arith.mulf %238, %237 : vector<2x32xf32>
    %240 = math.tanh %239 : vector<2x32xf32>
    %cst_81 = arith.constant 5.000000e-01 : f32
    %241 = vector.broadcast %cst_81 : f32 to vector<2x32xf32>
    %242 = arith.mulf %241, %240 : vector<2x32xf32>
    %cst_82 = arith.constant 5.000000e-01 : f32
    %243 = vector.broadcast %cst_82 : f32 to vector<2x32xf32>
    %244 = arith.addf %242, %243 : vector<2x32xf32>
    %245 = vector.extract_strided_slice %228 {offsets = [0, 64], sizes = [2, 32], strides = [1, 1]} : vector<2x128xf32> to vector<2x32xf32>
    %246 = math.tanh %245 : vector<2x32xf32>
    %247 = vector.extract_strided_slice %228 {offsets = [0, 96], sizes = [2, 32], strides = [1, 1]} : vector<2x128xf32> to vector<2x32xf32>
    %cst_83 = arith.constant 5.000000e-01 : f32
    %248 = vector.broadcast %cst_83 : f32 to vector<2x32xf32>
    %249 = arith.mulf %248, %247 : vector<2x32xf32>
    %250 = math.tanh %249 : vector<2x32xf32>
    %cst_84 = arith.constant 5.000000e-01 : f32
    %251 = vector.broadcast %cst_84 : f32 to vector<2x32xf32>
    %252 = arith.mulf %251, %250 : vector<2x32xf32>
    %cst_85 = arith.constant 5.000000e-01 : f32
    %253 = vector.broadcast %cst_85 : f32 to vector<2x32xf32>
    %254 = arith.addf %252, %253 : vector<2x32xf32>
    %255 = arith.mulf %244, %220 : vector<2x32xf32>
    %256 = arith.mulf %236, %246 : vector<2x32xf32>
    %257 = arith.addf %255, %256 : vector<2x32xf32>
    %258 = math.tanh %257 : vector<2x32xf32>
    %259 = arith.mulf %254, %258 : vector<2x32xf32>
    %260 = vector.extract_strided_slice %259 {offsets = [0, 0], sizes = [2, 16], strides = [1, 1]} : vector<2x32xf32> to vector<2x16xf32>
    %c10_86 = arith.constant 10 : index
    %c0_87 = arith.constant 0 : index
    %261 = vector.load %arg13[%c10_86, %c0_87] : memref<16x32xf32, #tpu.memory_space<vmem>>, vector<2x16xf32>
    tpu.vector_store %arg13[%c10_86, %c0_87], %260 {strides = array<i32>} : memref<16x32xf32, #tpu.memory_space<vmem>>, vector<2x16xf32>,
    %262 = vector.extract_strided_slice %259 {offsets = [0, 16], sizes = [2, 16], strides = [1, 1]} : vector<2x32xf32> to vector<2x16xf32>
    %c4_88 = arith.constant 4 : index
    %c16_89 = arith.constant 16 : index
    %263 = vector.load %arg13[%c4_88, %c16_89] : memref<16x32xf32, #tpu.memory_space<vmem>>, vector<2x16xf32>
    tpu.vector_store %arg13[%c4_88, %c16_89], %262 {strides = array<i32>} : memref<16x32xf32, #tpu.memory_space<vmem>>, vector<2x16xf32>,
    %cst_90 = arith.constant dense<0.000000e+00> : vector<2x128xf32>
    %264 = tpu.matmul %259, %11, %cst_90 {dimension_numbers = #tpu.dot_dimension_numbers<[1], [0], [0], [1], [0, 0, 1, 1], [], []>} : vector<2x32xf32>, vector<32x128xf32>, vector<2x128xf32> -> vector<2x128xf32>
    %265 = arith.addf %36, %264 : vector<2x128xf32>
    %266 = vector.extract_strided_slice %265 {offsets = [0, 0], sizes = [2, 32], strides = [1, 1]} : vector<2x128xf32> to vector<2x32xf32>
    %cst_91 = arith.constant 5.000000e-01 : f32
    %267 = vector.broadcast %cst_91 : f32 to vector<2x32xf32>
    %268 = arith.mulf %267, %266 : vector<2x32xf32>
    %269 = math.tanh %268 : vector<2x32xf32>
    %cst_92 = arith.constant 5.000000e-01 : f32
    %270 = vector.broadcast %cst_92 : f32 to vector<2x32xf32>
    %271 = arith.mulf %270, %269 : vector<2x32xf32>
    %cst_93 = arith.constant 5.000000e-01 : f32
    %272 = vector.broadcast %cst_93 : f32 to vector<2x32xf32>
    %273 = arith.addf %271, %272 : vector<2x32xf32>
    %274 = vector.extract_strided_slice %265 {offsets = [0, 32], sizes = [2, 32], strides = [1, 1]} : vector<2x128xf32> to vector<2x32xf32>
    %cst_94 = arith.constant 5.000000e-01 : f32
    %275 = vector.broadcast %cst_94 : f32 to vector<2x32xf32>
    %276 = arith.mulf %275, %274 : vector<2x32xf32>
    %277 = math.tanh %276 : vector<2x32xf32>
    %cst_95 = arith.constant 5.000000e-01 : f32
    %278 = vector.broadcast %cst_95 : f32 to vector<2x32xf32>
    %279 = arith.mulf %278, %277 : vector<2x32xf32>
    %cst_96 = arith.constant 5.000000e-01 : f32
    %280 = vector.broadcast %cst_96 : f32 to vector<2x32xf32>
    %281 = arith.addf %279, %280 : vector<2x32xf32>
    %282 = vector.extract_strided_slice %265 {offsets = [0, 64], sizes = [2, 32], strides = [1, 1]} : vector<2x128xf32> to vector<2x32xf32>
    %283 = math.tanh %282 : vector<2x32xf32>
    %284 = vector.extract_strided_slice %265 {offsets = [0, 96], sizes = [2, 32], strides = [1, 1]} : vector<2x128xf32> to vector<2x32xf32>
    %cst_97 = arith.constant 5.000000e-01 : f32
    %285 = vector.broadcast %cst_97 : f32 to vector<2x32xf32>
    %286 = arith.mulf %285, %284 : vector<2x32xf32>
    %287 = math.tanh %286 : vector<2x32xf32>
    %cst_98 = arith.constant 5.000000e-01 : f32
    %288 = vector.broadcast %cst_98 : f32 to vector<2x32xf32>
    %289 = arith.mulf %288, %287 : vector<2x32xf32>
    %cst_99 = arith.constant 5.000000e-01 : f32
    %290 = vector.broadcast %cst_99 : f32 to vector<2x32xf32>
    %291 = arith.addf %289, %290 : vector<2x32xf32>
    %292 = arith.mulf %281, %257 : vector<2x32xf32>
    %293 = arith.mulf %273, %283 : vector<2x32xf32>
    %294 = arith.addf %292, %293 : vector<2x32xf32>
    %295 = math.tanh %294 : vector<2x32xf32>
    %296 = arith.mulf %291, %295 : vector<2x32xf32>
    %297 = vector.extract_strided_slice %296 {offsets = [0, 0], sizes = [2, 16], strides = [1, 1]} : vector<2x32xf32> to vector<2x16xf32>
    %c12_100 = arith.constant 12 : index
    %c0_101 = arith.constant 0 : index
    %298 = vector.load %arg13[%c12_100, %c0_101] : memref<16x32xf32, #tpu.memory_space<vmem>>, vector<2x16xf32>
    tpu.vector_store %arg13[%c12_100, %c0_101], %297 {strides = array<i32>} : memref<16x32xf32, #tpu.memory_space<vmem>>, vector<2x16xf32>,
    %299 = vector.extract_strided_slice %296 {offsets = [0, 16], sizes = [2, 16], strides = [1, 1]} : vector<2x32xf32> to vector<2x16xf32>
    %c2_102 = arith.constant 2 : index
    %c16_103 = arith.constant 16 : index
    %300 = vector.load %arg13[%c2_102, %c16_103] : memref<16x32xf32, #tpu.memory_space<vmem>>, vector<2x16xf32>
    tpu.vector_store %arg13[%c2_102, %c16_103], %299 {strides = array<i32>} : memref<16x32xf32, #tpu.memory_space<vmem>>, vector<2x16xf32>,
    %cst_104 = arith.constant dense<0.000000e+00> : vector<2x128xf32>
    %301 = tpu.matmul %296, %11, %cst_104 {dimension_numbers = #tpu.dot_dimension_numbers<[1], [0], [0], [1], [0, 0, 1, 1], [], []>} : vector<2x32xf32>, vector<32x128xf32>, vector<2x128xf32> -> vector<2x128xf32>
    %302 = arith.addf %39, %301 : vector<2x128xf32>
    %303 = vector.extract_strided_slice %302 {offsets = [0, 0], sizes = [2, 32], strides = [1, 1]} : vector<2x128xf32> to vector<2x32xf32>
    %cst_105 = arith.constant 5.000000e-01 : f32
    %304 = vector.broadcast %cst_105 : f32 to vector<2x32xf32>
    %305 = arith.mulf %304, %303 : vector<2x32xf32>
    %306 = math.tanh %305 : vector<2x32xf32>
    %cst_106 = arith.constant 5.000000e-01 : f32
    %307 = vector.broadcast %cst_106 : f32 to vector<2x32xf32>
    %308 = arith.mulf %307, %306 : vector<2x32xf32>
    %cst_107 = arith.constant 5.000000e-01 : f32
    %309 = vector.broadcast %cst_107 : f32 to vector<2x32xf32>
    %310 = arith.addf %308, %309 : vector<2x32xf32>
    %311 = vector.extract_strided_slice %302 {offsets = [0, 32], sizes = [2, 32], strides = [1, 1]} : vector<2x128xf32> to vector<2x32xf32>
    %cst_108 = arith.constant 5.000000e-01 : f32
    %312 = vector.broadcast %cst_108 : f32 to vector<2x32xf32>
    %313 = arith.mulf %312, %311 : vector<2x32xf32>
    %314 = math.tanh %313 : vector<2x32xf32>
    %cst_109 = arith.constant 5.000000e-01 : f32
    %315 = vector.broadcast %cst_109 : f32 to vector<2x32xf32>
    %316 = arith.mulf %315, %314 : vector<2x32xf32>
    %cst_110 = arith.constant 5.000000e-01 : f32
    %317 = vector.broadcast %cst_110 : f32 to vector<2x32xf32>
    %318 = arith.addf %316, %317 : vector<2x32xf32>
    %319 = vector.extract_strided_slice %302 {offsets = [0, 64], sizes = [2, 32], strides = [1, 1]} : vector<2x128xf32> to vector<2x32xf32>
    %320 = math.tanh %319 : vector<2x32xf32>
    %321 = vector.extract_strided_slice %302 {offsets = [0, 96], sizes = [2, 32], strides = [1, 1]} : vector<2x128xf32> to vector<2x32xf32>
    %cst_111 = arith.constant 5.000000e-01 : f32
    %322 = vector.broadcast %cst_111 : f32 to vector<2x32xf32>
    %323 = arith.mulf %322, %321 : vector<2x32xf32>
    %324 = math.tanh %323 : vector<2x32xf32>
    %cst_112 = arith.constant 5.000000e-01 : f32
    %325 = vector.broadcast %cst_112 : f32 to vector<2x32xf32>
    %326 = arith.mulf %325, %324 : vector<2x32xf32>
    %cst_113 = arith.constant 5.000000e-01 : f32
    %327 = vector.broadcast %cst_113 : f32 to vector<2x32xf32>
    %328 = arith.addf %326, %327 : vector<2x32xf32>
    %329 = arith.mulf %318, %294 : vector<2x32xf32>
    %330 = arith.mulf %310, %320 : vector<2x32xf32>
    %331 = arith.addf %329, %330 : vector<2x32xf32>
    %332 = math.tanh %331 : vector<2x32xf32>
    %333 = arith.mulf %328, %332 : vector<2x32xf32>
    %334 = vector.extract_strided_slice %333 {offsets = [0, 0], sizes = [2, 16], strides = [1, 1]} : vector<2x32xf32> to vector<2x16xf32>
    %c14_114 = arith.constant 14 : index
    %c0_115 = arith.constant 0 : index
    %335 = vector.load %arg13[%c14_114, %c0_115] : memref<16x32xf32, #tpu.memory_space<vmem>>, vector<2x16xf32>
    tpu.vector_store %arg13[%c14_114, %c0_115], %334 {strides = array<i32>} : memref<16x32xf32, #tpu.memory_space<vmem>>, vector<2x16xf32>,
    %336 = vector.extract_strided_slice %333 {offsets = [0, 16], sizes = [2, 16], strides = [1, 1]} : vector<2x32xf32> to vector<2x16xf32>
    %c0_116 = arith.constant 0 : index
    %c16_117 = arith.constant 16 : index
    %337 = vector.load %arg13[%c0_116, %c16_117] : memref<16x32xf32, #tpu.memory_space<vmem>>, vector<2x16xf32>
    tpu.vector_store %arg13[%c0_116, %c16_117], %336 {strides = array<i32>} : memref<16x32xf32, #tpu.memory_space<vmem>>, vector<2x16xf32>,
    %c0_118 = arith.constant 0 : index
    %c0_119 = arith.constant 0 : index
    %338 = vector.load %arg6[%c0_118, %c0_119] : memref<32x256xf32, #tpu.memory_space<vmem>>, vector<32x256xf32>
    %c0_120 = arith.constant 0 : index
    %c0_121 = arith.constant 0 : index
    %339 = vector.load %arg7[%c0_120, %c0_121] : memref<32x128xf32, #tpu.memory_space<vmem>>, vector<32x128xf32>
    %c0_122 = arith.constant 0 : index
    %c0_123 = arith.constant 0 : index
    %340 = vector.load %arg8[%c0_122, %c0_123] : memref<1x256xf32, #tpu.memory_space<vmem>>, vector<1x256xf32>
    %c0_124 = arith.constant 0 : index
    %c0_125 = arith.constant 0 : index
    %341 = vector.load %arg13[%c0_124, %c0_125] : memref<16x32xf32, #tpu.memory_space<vmem>>, vector<16x32xf32>
    %cst_126 = arith.constant dense<0.000000e+00> : vector<16x256xf32>
    %342 = tpu.matmul %341, %338, %cst_126 {dimension_numbers = #tpu.dot_dimension_numbers<[1], [0], [0], [1], [0, 0, 1, 1], [], []>} : vector<16x32xf32>, vector<32x256xf32>, vector<16x256xf32> -> vector<16x256xf32>
    %343 = vector.broadcast %340 : vector<1x256xf32> to vector<16x256xf32>
    %344 = arith.addf %342, %343 : vector<16x256xf32>
    %345 = vector.extract_strided_slice %344 {offsets = [0, 0], sizes = [2, 128], strides = [1, 1]} : vector<16x256xf32> to vector<2x128xf32>
    %346 = vector.extract_strided_slice %344 {offsets = [14, 128], sizes = [2, 128], strides = [1, 1]} : vector<16x256xf32> to vector<2x128xf32>
    %347 = arith.addf %345, %346 : vector<2x128xf32>
    %348 = vector.extract_strided_slice %344 {offsets = [2, 0], sizes = [2, 128], strides = [1, 1]} : vector<16x256xf32> to vector<2x128xf32>
    %349 = vector.extract_strided_slice %344 {offsets = [12, 128], sizes = [2, 128], strides = [1, 1]} : vector<16x256xf32> to vector<2x128xf32>
    %350 = arith.addf %348, %349 : vector<2x128xf32>
    %351 = vector.extract_strided_slice %344 {offsets = [4, 0], sizes = [2, 128], strides = [1, 1]} : vector<16x256xf32> to vector<2x128xf32>
    %352 = vector.extract_strided_slice %344 {offsets = [10, 128], sizes = [2, 128], strides = [1, 1]} : vector<16x256xf32> to vector<2x128xf32>
    %353 = arith.addf %351, %352 : vector<2x128xf32>
    %354 = vector.extract_strided_slice %344 {offsets = [6, 0], sizes = [2, 128], strides = [1, 1]} : vector<16x256xf32> to vector<2x128xf32>
    %355 = vector.extract_strided_slice %344 {offsets = [8, 128], sizes = [2, 128], strides = [1, 1]} : vector<16x256xf32> to vector<2x128xf32>
    %356 = arith.addf %354, %355 : vector<2x128xf32>
    %357 = vector.extract_strided_slice %344 {offsets = [8, 0], sizes = [2, 128], strides = [1, 1]} : vector<16x256xf32> to vector<2x128xf32>
    %358 = vector.extract_strided_slice %344 {offsets = [6, 128], sizes = [2, 128], strides = [1, 1]} : vector<16x256xf32> to vector<2x128xf32>
    %359 = arith.addf %357, %358 : vector<2x128xf32>
    %360 = vector.extract_strided_slice %344 {offsets = [10, 0], sizes = [2, 128], strides = [1, 1]} : vector<16x256xf32> to vector<2x128xf32>
    %361 = vector.extract_strided_slice %344 {offsets = [4, 128], sizes = [2, 128], strides = [1, 1]} : vector<16x256xf32> to vector<2x128xf32>
    %362 = arith.addf %360, %361 : vector<2x128xf32>
    %363 = vector.extract_strided_slice %344 {offsets = [12, 0], sizes = [2, 128], strides = [1, 1]} : vector<16x256xf32> to vector<2x128xf32>
    %364 = vector.extract_strided_slice %344 {offsets = [2, 128], sizes = [2, 128], strides = [1, 1]} : vector<16x256xf32> to vector<2x128xf32>
    %365 = arith.addf %363, %364 : vector<2x128xf32>
    %366 = vector.extract_strided_slice %344 {offsets = [14, 0], sizes = [2, 128], strides = [1, 1]} : vector<16x256xf32> to vector<2x128xf32>
    %367 = vector.extract_strided_slice %344 {offsets = [0, 128], sizes = [2, 128], strides = [1, 1]} : vector<16x256xf32> to vector<2x128xf32>
    %368 = arith.addf %366, %367 : vector<2x128xf32>
    %cst_127 = arith.constant 0.000000e+00 : f32
    %369 = vector.broadcast %cst_127 : f32 to vector<2x32xf32>
    %cst_128 = arith.constant 0.000000e+00 : f32
    %370 = vector.broadcast %cst_128 : f32 to vector<2x32xf32>
    %cst_129 = arith.constant dense<0.000000e+00> : vector<2x128xf32>
    %371 = tpu.matmul %369, %339, %cst_129 {dimension_numbers = #tpu.dot_dimension_numbers<[1], [0], [0], [1], [0, 0, 1, 1], [], []>} : vector<2x32xf32>, vector<32x128xf32>, vector<2x128xf32> -> vector<2x128xf32>
    %372 = arith.addf %347, %371 : vector<2x128xf32>
    %373 = vector.extract_strided_slice %372 {offsets = [0, 0], sizes = [2, 32], strides = [1, 1]} : vector<2x128xf32> to vector<2x32xf32>
    %cst_130 = arith.constant 5.000000e-01 : f32
    %374 = vector.broadcast %cst_130 : f32 to vector<2x32xf32>
    %375 = arith.mulf %374, %373 : vector<2x32xf32>
    %376 = math.tanh %375 : vector<2x32xf32>
    %cst_131 = arith.constant 5.000000e-01 : f32
    %377 = vector.broadcast %cst_131 : f32 to vector<2x32xf32>
    %378 = arith.mulf %377, %376 : vector<2x32xf32>
    %cst_132 = arith.constant 5.000000e-01 : f32
    %379 = vector.broadcast %cst_132 : f32 to vector<2x32xf32>
    %380 = arith.addf %378, %379 : vector<2x32xf32>
    %381 = vector.extract_strided_slice %372 {offsets = [0, 32], sizes = [2, 32], strides = [1, 1]} : vector<2x128xf32> to vector<2x32xf32>
    %cst_133 = arith.constant 5.000000e-01 : f32
    %382 = vector.broadcast %cst_133 : f32 to vector<2x32xf32>
    %383 = arith.mulf %382, %381 : vector<2x32xf32>
    %384 = math.tanh %383 : vector<2x32xf32>
    %cst_134 = arith.constant 5.000000e-01 : f32
    %385 = vector.broadcast %cst_134 : f32 to vector<2x32xf32>
    %386 = arith.mulf %385, %384 : vector<2x32xf32>
    %cst_135 = arith.constant 5.000000e-01 : f32
    %387 = vector.broadcast %cst_135 : f32 to vector<2x32xf32>
    %388 = arith.addf %386, %387 : vector<2x32xf32>
    %389 = vector.extract_strided_slice %372 {offsets = [0, 64], sizes = [2, 32], strides = [1, 1]} : vector<2x128xf32> to vector<2x32xf32>
    %390 = math.tanh %389 : vector<2x32xf32>
    %391 = vector.extract_strided_slice %372 {offsets = [0, 96], sizes = [2, 32], strides = [1, 1]} : vector<2x128xf32> to vector<2x32xf32>
    %cst_136 = arith.constant 5.000000e-01 : f32
    %392 = vector.broadcast %cst_136 : f32 to vector<2x32xf32>
    %393 = arith.mulf %392, %391 : vector<2x32xf32>
    %394 = math.tanh %393 : vector<2x32xf32>
    %cst_137 = arith.constant 5.000000e-01 : f32
    %395 = vector.broadcast %cst_137 : f32 to vector<2x32xf32>
    %396 = arith.mulf %395, %394 : vector<2x32xf32>
    %cst_138 = arith.constant 5.000000e-01 : f32
    %397 = vector.broadcast %cst_138 : f32 to vector<2x32xf32>
    %398 = arith.addf %396, %397 : vector<2x32xf32>
    %399 = arith.mulf %388, %370 : vector<2x32xf32>
    %400 = arith.mulf %380, %390 : vector<2x32xf32>
    %401 = arith.addf %399, %400 : vector<2x32xf32>
    %402 = math.tanh %401 : vector<2x32xf32>
    %403 = arith.mulf %398, %402 : vector<2x32xf32>
    %c0_139 = arith.constant 0 : index
    %404 = memref.load %arg11[%c0_139] : memref<8xf32, #tpu.memory_space<smem>>
    %405 = vector.extract_strided_slice %403 {offsets = [0, 0], sizes = [2, 16], strides = [1, 1]} : vector<2x32xf32> to vector<2x16xf32>
    %406 = vector.broadcast %404 : f32 to vector<2x16xf32>
    %407 = arith.mulf %406, %405 : vector<2x16xf32>
    %408 = arith.addf %8, %407 : vector<2x16xf32>
    %c7 = arith.constant 7 : index
    %409 = memref.load %arg11[%c7] : memref<8xf32, #tpu.memory_space<smem>>
    %410 = vector.extract_strided_slice %403 {offsets = [0, 16], sizes = [2, 16], strides = [1, 1]} : vector<2x32xf32> to vector<2x16xf32>
    %411 = vector.broadcast %409 : f32 to vector<2x16xf32>
    %412 = arith.mulf %411, %410 : vector<2x16xf32>
    %413 = arith.addf %9, %412 : vector<2x16xf32>
    %cst_140 = arith.constant dense<0.000000e+00> : vector<2x128xf32>
    %414 = tpu.matmul %403, %339, %cst_140 {dimension_numbers = #tpu.dot_dimension_numbers<[1], [0], [0], [1], [0, 0, 1, 1], [], []>} : vector<2x32xf32>, vector<32x128xf32>, vector<2x128xf32> -> vector<2x128xf32>
    %415 = arith.addf %350, %414 : vector<2x128xf32>
    %416 = vector.extract_strided_slice %415 {offsets = [0, 0], sizes = [2, 32], strides = [1, 1]} : vector<2x128xf32> to vector<2x32xf32>
    %cst_141 = arith.constant 5.000000e-01 : f32
    %417 = vector.broadcast %cst_141 : f32 to vector<2x32xf32>
    %418 = arith.mulf %417, %416 : vector<2x32xf32>
    %419 = math.tanh %418 : vector<2x32xf32>
    %cst_142 = arith.constant 5.000000e-01 : f32
    %420 = vector.broadcast %cst_142 : f32 to vector<2x32xf32>
    %421 = arith.mulf %420, %419 : vector<2x32xf32>
    %cst_143 = arith.constant 5.000000e-01 : f32
    %422 = vector.broadcast %cst_143 : f32 to vector<2x32xf32>
    %423 = arith.addf %421, %422 : vector<2x32xf32>
    %424 = vector.extract_strided_slice %415 {offsets = [0, 32], sizes = [2, 32], strides = [1, 1]} : vector<2x128xf32> to vector<2x32xf32>
    %cst_144 = arith.constant 5.000000e-01 : f32
    %425 = vector.broadcast %cst_144 : f32 to vector<2x32xf32>
    %426 = arith.mulf %425, %424 : vector<2x32xf32>
    %427 = math.tanh %426 : vector<2x32xf32>
    %cst_145 = arith.constant 5.000000e-01 : f32
    %428 = vector.broadcast %cst_145 : f32 to vector<2x32xf32>
    %429 = arith.mulf %428, %427 : vector<2x32xf32>
    %cst_146 = arith.constant 5.000000e-01 : f32
    %430 = vector.broadcast %cst_146 : f32 to vector<2x32xf32>
    %431 = arith.addf %429, %430 : vector<2x32xf32>
    %432 = vector.extract_strided_slice %415 {offsets = [0, 64], sizes = [2, 32], strides = [1, 1]} : vector<2x128xf32> to vector<2x32xf32>
    %433 = math.tanh %432 : vector<2x32xf32>
    %434 = vector.extract_strided_slice %415 {offsets = [0, 96], sizes = [2, 32], strides = [1, 1]} : vector<2x128xf32> to vector<2x32xf32>
    %cst_147 = arith.constant 5.000000e-01 : f32
    %435 = vector.broadcast %cst_147 : f32 to vector<2x32xf32>
    %436 = arith.mulf %435, %434 : vector<2x32xf32>
    %437 = math.tanh %436 : vector<2x32xf32>
    %cst_148 = arith.constant 5.000000e-01 : f32
    %438 = vector.broadcast %cst_148 : f32 to vector<2x32xf32>
    %439 = arith.mulf %438, %437 : vector<2x32xf32>
    %cst_149 = arith.constant 5.000000e-01 : f32
    %440 = vector.broadcast %cst_149 : f32 to vector<2x32xf32>
    %441 = arith.addf %439, %440 : vector<2x32xf32>
    %442 = arith.mulf %431, %401 : vector<2x32xf32>
    %443 = arith.mulf %423, %433 : vector<2x32xf32>
    %444 = arith.addf %442, %443 : vector<2x32xf32>
    %445 = math.tanh %444 : vector<2x32xf32>
    %446 = arith.mulf %441, %445 : vector<2x32xf32>
    %c1 = arith.constant 1 : index
    %447 = memref.load %arg11[%c1] : memref<8xf32, #tpu.memory_space<smem>>
    %448 = vector.extract_strided_slice %446 {offsets = [0, 0], sizes = [2, 16], strides = [1, 1]} : vector<2x32xf32> to vector<2x16xf32>
    %449 = vector.broadcast %447 : f32 to vector<2x16xf32>
    %450 = arith.mulf %449, %448 : vector<2x16xf32>
    %451 = arith.addf %408, %450 : vector<2x16xf32>
    %c6_150 = arith.constant 6 : index
    %452 = memref.load %arg11[%c6_150] : memref<8xf32, #tpu.memory_space<smem>>
    %453 = vector.extract_strided_slice %446 {offsets = [0, 16], sizes = [2, 16], strides = [1, 1]} : vector<2x32xf32> to vector<2x16xf32>
    %454 = vector.broadcast %452 : f32 to vector<2x16xf32>
    %455 = arith.mulf %454, %453 : vector<2x16xf32>
    %456 = arith.addf %413, %455 : vector<2x16xf32>
    %cst_151 = arith.constant dense<0.000000e+00> : vector<2x128xf32>
    %457 = tpu.matmul %446, %339, %cst_151 {dimension_numbers = #tpu.dot_dimension_numbers<[1], [0], [0], [1], [0, 0, 1, 1], [], []>} : vector<2x32xf32>, vector<32x128xf32>, vector<2x128xf32> -> vector<2x128xf32>
    %458 = arith.addf %353, %457 : vector<2x128xf32>
    %459 = vector.extract_strided_slice %458 {offsets = [0, 0], sizes = [2, 32], strides = [1, 1]} : vector<2x128xf32> to vector<2x32xf32>
    %cst_152 = arith.constant 5.000000e-01 : f32
    %460 = vector.broadcast %cst_152 : f32 to vector<2x32xf32>
    %461 = arith.mulf %460, %459 : vector<2x32xf32>
    %462 = math.tanh %461 : vector<2x32xf32>
    %cst_153 = arith.constant 5.000000e-01 : f32
    %463 = vector.broadcast %cst_153 : f32 to vector<2x32xf32>
    %464 = arith.mulf %463, %462 : vector<2x32xf32>
    %cst_154 = arith.constant 5.000000e-01 : f32
    %465 = vector.broadcast %cst_154 : f32 to vector<2x32xf32>
    %466 = arith.addf %464, %465 : vector<2x32xf32>
    %467 = vector.extract_strided_slice %458 {offsets = [0, 32], sizes = [2, 32], strides = [1, 1]} : vector<2x128xf32> to vector<2x32xf32>
    %cst_155 = arith.constant 5.000000e-01 : f32
    %468 = vector.broadcast %cst_155 : f32 to vector<2x32xf32>
    %469 = arith.mulf %468, %467 : vector<2x32xf32>
    %470 = math.tanh %469 : vector<2x32xf32>
    %cst_156 = arith.constant 5.000000e-01 : f32
    %471 = vector.broadcast %cst_156 : f32 to vector<2x32xf32>
    %472 = arith.mulf %471, %470 : vector<2x32xf32>
    %cst_157 = arith.constant 5.000000e-01 : f32
    %473 = vector.broadcast %cst_157 : f32 to vector<2x32xf32>
    %474 = arith.addf %472, %473 : vector<2x32xf32>
    %475 = vector.extract_strided_slice %458 {offsets = [0, 64], sizes = [2, 32], strides = [1, 1]} : vector<2x128xf32> to vector<2x32xf32>
    %476 = math.tanh %475 : vector<2x32xf32>
    %477 = vector.extract_strided_slice %458 {offsets = [0, 96], sizes = [2, 32], strides = [1, 1]} : vector<2x128xf32> to vector<2x32xf32>
    %cst_158 = arith.constant 5.000000e-01 : f32
    %478 = vector.broadcast %cst_158 : f32 to vector<2x32xf32>
    %479 = arith.mulf %478, %477 : vector<2x32xf32>
    %480 = math.tanh %479 : vector<2x32xf32>
    %cst_159 = arith.constant 5.000000e-01 : f32
    %481 = vector.broadcast %cst_159 : f32 to vector<2x32xf32>
    %482 = arith.mulf %481, %480 : vector<2x32xf32>
    %cst_160 = arith.constant 5.000000e-01 : f32
    %483 = vector.broadcast %cst_160 : f32 to vector<2x32xf32>
    %484 = arith.addf %482, %483 : vector<2x32xf32>
    %485 = arith.mulf %474, %444 : vector<2x32xf32>
    %486 = arith.mulf %466, %476 : vector<2x32xf32>
    %487 = arith.addf %485, %486 : vector<2x32xf32>
    %488 = math.tanh %487 : vector<2x32xf32>
    %489 = arith.mulf %484, %488 : vector<2x32xf32>
    %c2_161 = arith.constant 2 : index
    %490 = memref.load %arg11[%c2_161] : memref<8xf32, #tpu.memory_space<smem>>
    %491 = vector.extract_strided_slice %489 {offsets = [0, 0], sizes = [2, 16], strides = [1, 1]} : vector<2x32xf32> to vector<2x16xf32>
    %492 = vector.broadcast %490 : f32 to vector<2x16xf32>
    %493 = arith.mulf %492, %491 : vector<2x16xf32>
    %494 = arith.addf %451, %493 : vector<2x16xf32>
    %c5 = arith.constant 5 : index
    %495 = memref.load %arg11[%c5] : memref<8xf32, #tpu.memory_space<smem>>
    %496 = vector.extract_strided_slice %489 {offsets = [0, 16], sizes = [2, 16], strides = [1, 1]} : vector<2x32xf32> to vector<2x16xf32>
    %497 = vector.broadcast %495 : f32 to vector<2x16xf32>
    %498 = arith.mulf %497, %496 : vector<2x16xf32>
    %499 = arith.addf %456, %498 : vector<2x16xf32>
    %cst_162 = arith.constant dense<0.000000e+00> : vector<2x128xf32>
    %500 = tpu.matmul %489, %339, %cst_162 {dimension_numbers = #tpu.dot_dimension_numbers<[1], [0], [0], [1], [0, 0, 1, 1], [], []>} : vector<2x32xf32>, vector<32x128xf32>, vector<2x128xf32> -> vector<2x128xf32>
    %501 = arith.addf %356, %500 : vector<2x128xf32>
    %502 = vector.extract_strided_slice %501 {offsets = [0, 0], sizes = [2, 32], strides = [1, 1]} : vector<2x128xf32> to vector<2x32xf32>
    %cst_163 = arith.constant 5.000000e-01 : f32
    %503 = vector.broadcast %cst_163 : f32 to vector<2x32xf32>
    %504 = arith.mulf %503, %502 : vector<2x32xf32>
    %505 = math.tanh %504 : vector<2x32xf32>
    %cst_164 = arith.constant 5.000000e-01 : f32
    %506 = vector.broadcast %cst_164 : f32 to vector<2x32xf32>
    %507 = arith.mulf %506, %505 : vector<2x32xf32>
    %cst_165 = arith.constant 5.000000e-01 : f32
    %508 = vector.broadcast %cst_165 : f32 to vector<2x32xf32>
    %509 = arith.addf %507, %508 : vector<2x32xf32>
    %510 = vector.extract_strided_slice %501 {offsets = [0, 32], sizes = [2, 32], strides = [1, 1]} : vector<2x128xf32> to vector<2x32xf32>
    %cst_166 = arith.constant 5.000000e-01 : f32
    %511 = vector.broadcast %cst_166 : f32 to vector<2x32xf32>
    %512 = arith.mulf %511, %510 : vector<2x32xf32>
    %513 = math.tanh %512 : vector<2x32xf32>
    %cst_167 = arith.constant 5.000000e-01 : f32
    %514 = vector.broadcast %cst_167 : f32 to vector<2x32xf32>
    %515 = arith.mulf %514, %513 : vector<2x32xf32>
    %cst_168 = arith.constant 5.000000e-01 : f32
    %516 = vector.broadcast %cst_168 : f32 to vector<2x32xf32>
    %517 = arith.addf %515, %516 : vector<2x32xf32>
    %518 = vector.extract_strided_slice %501 {offsets = [0, 64], sizes = [2, 32], strides = [1, 1]} : vector<2x128xf32> to vector<2x32xf32>
    %519 = math.tanh %518 : vector<2x32xf32>
    %520 = vector.extract_strided_slice %501 {offsets = [0, 96], sizes = [2, 32], strides = [1, 1]} : vector<2x128xf32> to vector<2x32xf32>
    %cst_169 = arith.constant 5.000000e-01 : f32
    %521 = vector.broadcast %cst_169 : f32 to vector<2x32xf32>
    %522 = arith.mulf %521, %520 : vector<2x32xf32>
    %523 = math.tanh %522 : vector<2x32xf32>
    %cst_170 = arith.constant 5.000000e-01 : f32
    %524 = vector.broadcast %cst_170 : f32 to vector<2x32xf32>
    %525 = arith.mulf %524, %523 : vector<2x32xf32>
    %cst_171 = arith.constant 5.000000e-01 : f32
    %526 = vector.broadcast %cst_171 : f32 to vector<2x32xf32>
    %527 = arith.addf %525, %526 : vector<2x32xf32>
    %528 = arith.mulf %517, %487 : vector<2x32xf32>
    %529 = arith.mulf %509, %519 : vector<2x32xf32>
    %530 = arith.addf %528, %529 : vector<2x32xf32>
    %531 = math.tanh %530 : vector<2x32xf32>
    %532 = arith.mulf %527, %531 : vector<2x32xf32>
    %c3 = arith.constant 3 : index
    %533 = memref.load %arg11[%c3] : memref<8xf32, #tpu.memory_space<smem>>
    %534 = vector.extract_strided_slice %532 {offsets = [0, 0], sizes = [2, 16], strides = [1, 1]} : vector<2x32xf32> to vector<2x16xf32>
    %535 = vector.broadcast %533 : f32 to vector<2x16xf32>
    %536 = arith.mulf %535, %534 : vector<2x16xf32>
    %537 = arith.addf %494, %536 : vector<2x16xf32>
    %c4_172 = arith.constant 4 : index
    %538 = memref.load %arg11[%c4_172] : memref<8xf32, #tpu.memory_space<smem>>
    %539 = vector.extract_strided_slice %532 {offsets = [0, 16], sizes = [2, 16], strides = [1, 1]} : vector<2x32xf32> to vector<2x16xf32>
    %540 = vector.broadcast %538 : f32 to vector<2x16xf32>
    %541 = arith.mulf %540, %539 : vector<2x16xf32>
    %542 = arith.addf %499, %541 : vector<2x16xf32>
    %cst_173 = arith.constant dense<0.000000e+00> : vector<2x128xf32>
    %543 = tpu.matmul %532, %339, %cst_173 {dimension_numbers = #tpu.dot_dimension_numbers<[1], [0], [0], [1], [0, 0, 1, 1], [], []>} : vector<2x32xf32>, vector<32x128xf32>, vector<2x128xf32> -> vector<2x128xf32>
    %544 = arith.addf %359, %543 : vector<2x128xf32>
    %545 = vector.extract_strided_slice %544 {offsets = [0, 0], sizes = [2, 32], strides = [1, 1]} : vector<2x128xf32> to vector<2x32xf32>
    %cst_174 = arith.constant 5.000000e-01 : f32
    %546 = vector.broadcast %cst_174 : f32 to vector<2x32xf32>
    %547 = arith.mulf %546, %545 : vector<2x32xf32>
    %548 = math.tanh %547 : vector<2x32xf32>
    %cst_175 = arith.constant 5.000000e-01 : f32
    %549 = vector.broadcast %cst_175 : f32 to vector<2x32xf32>
    %550 = arith.mulf %549, %548 : vector<2x32xf32>
    %cst_176 = arith.constant 5.000000e-01 : f32
    %551 = vector.broadcast %cst_176 : f32 to vector<2x32xf32>
    %552 = arith.addf %550, %551 : vector<2x32xf32>
    %553 = vector.extract_strided_slice %544 {offsets = [0, 32], sizes = [2, 32], strides = [1, 1]} : vector<2x128xf32> to vector<2x32xf32>
    %cst_177 = arith.constant 5.000000e-01 : f32
    %554 = vector.broadcast %cst_177 : f32 to vector<2x32xf32>
    %555 = arith.mulf %554, %553 : vector<2x32xf32>
    %556 = math.tanh %555 : vector<2x32xf32>
    %cst_178 = arith.constant 5.000000e-01 : f32
    %557 = vector.broadcast %cst_178 : f32 to vector<2x32xf32>
    %558 = arith.mulf %557, %556 : vector<2x32xf32>
    %cst_179 = arith.constant 5.000000e-01 : f32
    %559 = vector.broadcast %cst_179 : f32 to vector<2x32xf32>
    %560 = arith.addf %558, %559 : vector<2x32xf32>
    %561 = vector.extract_strided_slice %544 {offsets = [0, 64], sizes = [2, 32], strides = [1, 1]} : vector<2x128xf32> to vector<2x32xf32>
    %562 = math.tanh %561 : vector<2x32xf32>
    %563 = vector.extract_strided_slice %544 {offsets = [0, 96], sizes = [2, 32], strides = [1, 1]} : vector<2x128xf32> to vector<2x32xf32>
    %cst_180 = arith.constant 5.000000e-01 : f32
    %564 = vector.broadcast %cst_180 : f32 to vector<2x32xf32>
    %565 = arith.mulf %564, %563 : vector<2x32xf32>
    %566 = math.tanh %565 : vector<2x32xf32>
    %cst_181 = arith.constant 5.000000e-01 : f32
    %567 = vector.broadcast %cst_181 : f32 to vector<2x32xf32>
    %568 = arith.mulf %567, %566 : vector<2x32xf32>
    %cst_182 = arith.constant 5.000000e-01 : f32
    %569 = vector.broadcast %cst_182 : f32 to vector<2x32xf32>
    %570 = arith.addf %568, %569 : vector<2x32xf32>
    %571 = arith.mulf %560, %530 : vector<2x32xf32>
    %572 = arith.mulf %552, %562 : vector<2x32xf32>
    %573 = arith.addf %571, %572 : vector<2x32xf32>
    %574 = math.tanh %573 : vector<2x32xf32>
    %575 = arith.mulf %570, %574 : vector<2x32xf32>
    %c4_183 = arith.constant 4 : index
    %576 = memref.load %arg11[%c4_183] : memref<8xf32, #tpu.memory_space<smem>>
    %577 = vector.extract_strided_slice %575 {offsets = [0, 0], sizes = [2, 16], strides = [1, 1]} : vector<2x32xf32> to vector<2x16xf32>
    %578 = vector.broadcast %576 : f32 to vector<2x16xf32>
    %579 = arith.mulf %578, %577 : vector<2x16xf32>
    %580 = arith.addf %537, %579 : vector<2x16xf32>
    %c3_184 = arith.constant 3 : index
    %581 = memref.load %arg11[%c3_184] : memref<8xf32, #tpu.memory_space<smem>>
    %582 = vector.extract_strided_slice %575 {offsets = [0, 16], sizes = [2, 16], strides = [1, 1]} : vector<2x32xf32> to vector<2x16xf32>
    %583 = vector.broadcast %581 : f32 to vector<2x16xf32>
    %584 = arith.mulf %583, %582 : vector<2x16xf32>
    %585 = arith.addf %542, %584 : vector<2x16xf32>
    %cst_185 = arith.constant dense<0.000000e+00> : vector<2x128xf32>
    %586 = tpu.matmul %575, %339, %cst_185 {dimension_numbers = #tpu.dot_dimension_numbers<[1], [0], [0], [1], [0, 0, 1, 1], [], []>} : vector<2x32xf32>, vector<32x128xf32>, vector<2x128xf32> -> vector<2x128xf32>
    %587 = arith.addf %362, %586 : vector<2x128xf32>
    %588 = vector.extract_strided_slice %587 {offsets = [0, 0], sizes = [2, 32], strides = [1, 1]} : vector<2x128xf32> to vector<2x32xf32>
    %cst_186 = arith.constant 5.000000e-01 : f32
    %589 = vector.broadcast %cst_186 : f32 to vector<2x32xf32>
    %590 = arith.mulf %589, %588 : vector<2x32xf32>
    %591 = math.tanh %590 : vector<2x32xf32>
    %cst_187 = arith.constant 5.000000e-01 : f32
    %592 = vector.broadcast %cst_187 : f32 to vector<2x32xf32>
    %593 = arith.mulf %592, %591 : vector<2x32xf32>
    %cst_188 = arith.constant 5.000000e-01 : f32
    %594 = vector.broadcast %cst_188 : f32 to vector<2x32xf32>
    %595 = arith.addf %593, %594 : vector<2x32xf32>
    %596 = vector.extract_strided_slice %587 {offsets = [0, 32], sizes = [2, 32], strides = [1, 1]} : vector<2x128xf32> to vector<2x32xf32>
    %cst_189 = arith.constant 5.000000e-01 : f32
    %597 = vector.broadcast %cst_189 : f32 to vector<2x32xf32>
    %598 = arith.mulf %597, %596 : vector<2x32xf32>
    %599 = math.tanh %598 : vector<2x32xf32>
    %cst_190 = arith.constant 5.000000e-01 : f32
    %600 = vector.broadcast %cst_190 : f32 to vector<2x32xf32>
    %601 = arith.mulf %600, %599 : vector<2x32xf32>
    %cst_191 = arith.constant 5.000000e-01 : f32
    %602 = vector.broadcast %cst_191 : f32 to vector<2x32xf32>
    %603 = arith.addf %601, %602 : vector<2x32xf32>
    %604 = vector.extract_strided_slice %587 {offsets = [0, 64], sizes = [2, 32], strides = [1, 1]} : vector<2x128xf32> to vector<2x32xf32>
    %605 = math.tanh %604 : vector<2x32xf32>
    %606 = vector.extract_strided_slice %587 {offsets = [0, 96], sizes = [2, 32], strides = [1, 1]} : vector<2x128xf32> to vector<2x32xf32>
    %cst_192 = arith.constant 5.000000e-01 : f32
    %607 = vector.broadcast %cst_192 : f32 to vector<2x32xf32>
    %608 = arith.mulf %607, %606 : vector<2x32xf32>
    %609 = math.tanh %608 : vector<2x32xf32>
    %cst_193 = arith.constant 5.000000e-01 : f32
    %610 = vector.broadcast %cst_193 : f32 to vector<2x32xf32>
    %611 = arith.mulf %610, %609 : vector<2x32xf32>
    %cst_194 = arith.constant 5.000000e-01 : f32
    %612 = vector.broadcast %cst_194 : f32 to vector<2x32xf32>
    %613 = arith.addf %611, %612 : vector<2x32xf32>
    %614 = arith.mulf %603, %573 : vector<2x32xf32>
    %615 = arith.mulf %595, %605 : vector<2x32xf32>
    %616 = arith.addf %614, %615 : vector<2x32xf32>
    %617 = math.tanh %616 : vector<2x32xf32>
    %618 = arith.mulf %613, %617 : vector<2x32xf32>
    %c5_195 = arith.constant 5 : index
    %619 = memref.load %arg11[%c5_195] : memref<8xf32, #tpu.memory_space<smem>>
    %620 = vector.extract_strided_slice %618 {offsets = [0, 0], sizes = [2, 16], strides = [1, 1]} : vector<2x32xf32> to vector<2x16xf32>
    %621 = vector.broadcast %619 : f32 to vector<2x16xf32>
    %622 = arith.mulf %621, %620 : vector<2x16xf32>
    %623 = arith.addf %580, %622 : vector<2x16xf32>
    %c2_196 = arith.constant 2 : index
    %624 = memref.load %arg11[%c2_196] : memref<8xf32, #tpu.memory_space<smem>>
    %625 = vector.extract_strided_slice %618 {offsets = [0, 16], sizes = [2, 16], strides = [1, 1]} : vector<2x32xf32> to vector<2x16xf32>
    %626 = vector.broadcast %624 : f32 to vector<2x16xf32>
    %627 = arith.mulf %626, %625 : vector<2x16xf32>
    %628 = arith.addf %585, %627 : vector<2x16xf32>
    %cst_197 = arith.constant dense<0.000000e+00> : vector<2x128xf32>
    %629 = tpu.matmul %618, %339, %cst_197 {dimension_numbers = #tpu.dot_dimension_numbers<[1], [0], [0], [1], [0, 0, 1, 1], [], []>} : vector<2x32xf32>, vector<32x128xf32>, vector<2x128xf32> -> vector<2x128xf32>
    %630 = arith.addf %365, %629 : vector<2x128xf32>
    %631 = vector.extract_strided_slice %630 {offsets = [0, 0], sizes = [2, 32], strides = [1, 1]} : vector<2x128xf32> to vector<2x32xf32>
    %cst_198 = arith.constant 5.000000e-01 : f32
    %632 = vector.broadcast %cst_198 : f32 to vector<2x32xf32>
    %633 = arith.mulf %632, %631 : vector<2x32xf32>
    %634 = math.tanh %633 : vector<2x32xf32>
    %cst_199 = arith.constant 5.000000e-01 : f32
    %635 = vector.broadcast %cst_199 : f32 to vector<2x32xf32>
    %636 = arith.mulf %635, %634 : vector<2x32xf32>
    %cst_200 = arith.constant 5.000000e-01 : f32
    %637 = vector.broadcast %cst_200 : f32 to vector<2x32xf32>
    %638 = arith.addf %636, %637 : vector<2x32xf32>
    %639 = vector.extract_strided_slice %630 {offsets = [0, 32], sizes = [2, 32], strides = [1, 1]} : vector<2x128xf32> to vector<2x32xf32>
    %cst_201 = arith.constant 5.000000e-01 : f32
    %640 = vector.broadcast %cst_201 : f32 to vector<2x32xf32>
    %641 = arith.mulf %640, %639 : vector<2x32xf32>
    %642 = math.tanh %641 : vector<2x32xf32>
    %cst_202 = arith.constant 5.000000e-01 : f32
    %643 = vector.broadcast %cst_202 : f32 to vector<2x32xf32>
    %644 = arith.mulf %643, %642 : vector<2x32xf32>
    %cst_203 = arith.constant 5.000000e-01 : f32
    %645 = vector.broadcast %cst_203 : f32 to vector<2x32xf32>
    %646 = arith.addf %644, %645 : vector<2x32xf32>
    %647 = vector.extract_strided_slice %630 {offsets = [0, 64], sizes = [2, 32], strides = [1, 1]} : vector<2x128xf32> to vector<2x32xf32>
    %648 = math.tanh %647 : vector<2x32xf32>
    %649 = vector.extract_strided_slice %630 {offsets = [0, 96], sizes = [2, 32], strides = [1, 1]} : vector<2x128xf32> to vector<2x32xf32>
    %cst_204 = arith.constant 5.000000e-01 : f32
    %650 = vector.broadcast %cst_204 : f32 to vector<2x32xf32>
    %651 = arith.mulf %650, %649 : vector<2x32xf32>
    %652 = math.tanh %651 : vector<2x32xf32>
    %cst_205 = arith.constant 5.000000e-01 : f32
    %653 = vector.broadcast %cst_205 : f32 to vector<2x32xf32>
    %654 = arith.mulf %653, %652 : vector<2x32xf32>
    %cst_206 = arith.constant 5.000000e-01 : f32
    %655 = vector.broadcast %cst_206 : f32 to vector<2x32xf32>
    %656 = arith.addf %654, %655 : vector<2x32xf32>
    %657 = arith.mulf %646, %616 : vector<2x32xf32>
    %658 = arith.mulf %638, %648 : vector<2x32xf32>
    %659 = arith.addf %657, %658 : vector<2x32xf32>
    %660 = math.tanh %659 : vector<2x32xf32>
    %661 = arith.mulf %656, %660 : vector<2x32xf32>
    %c6_207 = arith.constant 6 : index
    %662 = memref.load %arg11[%c6_207] : memref<8xf32, #tpu.memory_space<smem>>
    %663 = vector.extract_strided_slice %661 {offsets = [0, 0], sizes = [2, 16], strides = [1, 1]} : vector<2x32xf32> to vector<2x16xf32>
    %664 = vector.broadcast %662 : f32 to vector<2x16xf32>
    %665 = arith.mulf %664, %663 : vector<2x16xf32>
    %666 = arith.addf %623, %665 : vector<2x16xf32>
    %c1_208 = arith.constant 1 : index
    %667 = memref.load %arg11[%c1_208] : memref<8xf32, #tpu.memory_space<smem>>
    %668 = vector.extract_strided_slice %661 {offsets = [0, 16], sizes = [2, 16], strides = [1, 1]} : vector<2x32xf32> to vector<2x16xf32>
    %669 = vector.broadcast %667 : f32 to vector<2x16xf32>
    %670 = arith.mulf %669, %668 : vector<2x16xf32>
    %671 = arith.addf %628, %670 : vector<2x16xf32>
    %cst_209 = arith.constant dense<0.000000e+00> : vector<2x128xf32>
    %672 = tpu.matmul %661, %339, %cst_209 {dimension_numbers = #tpu.dot_dimension_numbers<[1], [0], [0], [1], [0, 0, 1, 1], [], []>} : vector<2x32xf32>, vector<32x128xf32>, vector<2x128xf32> -> vector<2x128xf32>
    %673 = arith.addf %368, %672 : vector<2x128xf32>
    %674 = vector.extract_strided_slice %673 {offsets = [0, 0], sizes = [2, 32], strides = [1, 1]} : vector<2x128xf32> to vector<2x32xf32>
    %cst_210 = arith.constant 5.000000e-01 : f32
    %675 = vector.broadcast %cst_210 : f32 to vector<2x32xf32>
    %676 = arith.mulf %675, %674 : vector<2x32xf32>
    %677 = math.tanh %676 : vector<2x32xf32>
    %cst_211 = arith.constant 5.000000e-01 : f32
    %678 = vector.broadcast %cst_211 : f32 to vector<2x32xf32>
    %679 = arith.mulf %678, %677 : vector<2x32xf32>
    %cst_212 = arith.constant 5.000000e-01 : f32
    %680 = vector.broadcast %cst_212 : f32 to vector<2x32xf32>
    %681 = arith.addf %679, %680 : vector<2x32xf32>
    %682 = vector.extract_strided_slice %673 {offsets = [0, 32], sizes = [2, 32], strides = [1, 1]} : vector<2x128xf32> to vector<2x32xf32>
    %cst_213 = arith.constant 5.000000e-01 : f32
    %683 = vector.broadcast %cst_213 : f32 to vector<2x32xf32>
    %684 = arith.mulf %683, %682 : vector<2x32xf32>
    %685 = math.tanh %684 : vector<2x32xf32>
    %cst_214 = arith.constant 5.000000e-01 : f32
    %686 = vector.broadcast %cst_214 : f32 to vector<2x32xf32>
    %687 = arith.mulf %686, %685 : vector<2x32xf32>
    %cst_215 = arith.constant 5.000000e-01 : f32
    %688 = vector.broadcast %cst_215 : f32 to vector<2x32xf32>
    %689 = arith.addf %687, %688 : vector<2x32xf32>
    %690 = vector.extract_strided_slice %673 {offsets = [0, 64], sizes = [2, 32], strides = [1, 1]} : vector<2x128xf32> to vector<2x32xf32>
    %691 = math.tanh %690 : vector<2x32xf32>
    %692 = vector.extract_strided_slice %673 {offsets = [0, 96], sizes = [2, 32], strides = [1, 1]} : vector<2x128xf32> to vector<2x32xf32>
    %cst_216 = arith.constant 5.000000e-01 : f32
    %693 = vector.broadcast %cst_216 : f32 to vector<2x32xf32>
    %694 = arith.mulf %693, %692 : vector<2x32xf32>
    %695 = math.tanh %694 : vector<2x32xf32>
    %cst_217 = arith.constant 5.000000e-01 : f32
    %696 = vector.broadcast %cst_217 : f32 to vector<2x32xf32>
    %697 = arith.mulf %696, %695 : vector<2x32xf32>
    %cst_218 = arith.constant 5.000000e-01 : f32
    %698 = vector.broadcast %cst_218 : f32 to vector<2x32xf32>
    %699 = arith.addf %697, %698 : vector<2x32xf32>
    %700 = arith.mulf %689, %659 : vector<2x32xf32>
    %701 = arith.mulf %681, %691 : vector<2x32xf32>
    %702 = arith.addf %700, %701 : vector<2x32xf32>
    %703 = math.tanh %702 : vector<2x32xf32>
    %704 = arith.mulf %699, %703 : vector<2x32xf32>
    %c7_219 = arith.constant 7 : index
    %705 = memref.load %arg11[%c7_219] : memref<8xf32, #tpu.memory_space<smem>>
    %706 = vector.extract_strided_slice %704 {offsets = [0, 0], sizes = [2, 16], strides = [1, 1]} : vector<2x32xf32> to vector<2x16xf32>
    %707 = vector.broadcast %705 : f32 to vector<2x16xf32>
    %708 = arith.mulf %707, %706 : vector<2x16xf32>
    %709 = arith.addf %666, %708 : vector<2x16xf32>
    %c0_220 = arith.constant 0 : index
    %710 = memref.load %arg11[%c0_220] : memref<8xf32, #tpu.memory_space<smem>>
    %711 = vector.extract_strided_slice %704 {offsets = [0, 16], sizes = [2, 16], strides = [1, 1]} : vector<2x32xf32> to vector<2x16xf32>
    %712 = vector.broadcast %710 : f32 to vector<2x16xf32>
    %713 = arith.mulf %712, %711 : vector<2x16xf32>
    %714 = arith.addf %671, %713 : vector<2x16xf32>
    %c0_221 = arith.constant 0 : index
    %c0_222 = arith.constant 0 : index
    %715 = vector.load %arg9[%c0_221, %c0_222] : memref<32x5xf32, #tpu.memory_space<vmem>>, vector<16x5xf32>
    %cst_223 = arith.constant dense<0.000000e+00> : vector<2x5xf32>
    %716 = tpu.matmul %709, %715, %cst_223 {dimension_numbers = #tpu.dot_dimension_numbers<[1], [0], [0], [1], [0, 0, 1, 1], [], []>} : vector<2x16xf32>, vector<16x5xf32>, vector<2x5xf32> -> vector<2x5xf32>
    %c16_224 = arith.constant 16 : index
    %c0_225 = arith.constant 0 : index
    %717 = vector.load %arg9[%c16_224, %c0_225] : memref<32x5xf32, #tpu.memory_space<vmem>>, vector<16x5xf32>
    %cst_226 = arith.constant dense<0.000000e+00> : vector<2x5xf32>
    %718 = tpu.matmul %714, %717, %cst_226 {dimension_numbers = #tpu.dot_dimension_numbers<[1], [0], [0], [1], [0, 0, 1, 1], [], []>} : vector<2x16xf32>, vector<16x5xf32>, vector<2x5xf32> -> vector<2x5xf32>
    %719 = arith.addf %716, %718 : vector<2x5xf32>
    %c0_227 = arith.constant 0 : index
    %c0_228 = arith.constant 0 : index
    %720 = vector.load %arg10[%c0_227, %c0_228] : memref<1x5xf32, #tpu.memory_space<vmem>>, vector<1x5xf32>
    %721 = vector.broadcast %720 : vector<1x5xf32> to vector<2x5xf32>
    %722 = arith.addf %719, %721 : vector<2x5xf32>
    %c0_229 = arith.constant 0 : index
    %c0_230 = arith.constant 0 : index
    %723 = vector.load %arg12[%c0_229, %c0_230] : memref<2x5xf32, #tpu.memory_space<vmem>>, vector<2x5xf32>
    tpu.vector_store %arg12[%c0_229, %c0_230], %722 {strides = array<i32>} : memref<2x5xf32, #tpu.memory_space<vmem>>, vector<2x5xf32>,
    return
  }
  func.func @transform_0(%arg0: i32) -> (i32, i32) {
    %c0_i32 = arith.constant 0 : i32
    %c0_i32_0 = arith.constant 0 : i32
    %c0_i32_1 = arith.constant 0 : i32
    return %c0_i32, %c0_i32_0 : i32, i32
  }
  func.func @transform_1(%arg0: i32) -> (i32, i32) {
    %c0_i32 = arith.constant 0 : i32
    %c0_i32_0 = arith.constant 0 : i32
    %c0_i32_1 = arith.constant 0 : i32
    return %c0_i32, %c0_i32_0 : i32, i32
  }
  func.func @transform_2(%arg0: i32) -> (i32, i32) {
    %c0_i32 = arith.constant 0 : i32
    %c0_i32_0 = arith.constant 0 : i32
    %c0_i32_1 = arith.constant 0 : i32
    return %c0_i32, %c0_i32_0 : i32, i32
  }
  func.func @transform_3(%arg0: i32) -> (i32, i32) {
    %c0_i32 = arith.constant 0 : i32
    %c0_i32_0 = arith.constant 0 : i32
    %c0_i32_1 = arith.constant 0 : i32
    return %c0_i32, %c0_i32_0 : i32, i32
  }
  func.func @transform_4(%arg0: i32) -> (i32, i32) {
    %c0_i32 = arith.constant 0 : i32
    %c0_i32_0 = arith.constant 0 : i32
    %c0_i32_1 = arith.constant 0 : i32
    return %c0_i32, %c0_i32_0 : i32, i32
  }
  func.func @transform_5(%arg0: i32) -> (i32, i32) {
    %c0_i32 = arith.constant 0 : i32
    %c0_i32_0 = arith.constant 0 : i32
    %c0_i32_1 = arith.constant 0 : i32
    return %c0_i32, %c0_i32_0 : i32, i32
  }
  func.func @transform_6(%arg0: i32) -> (i32, i32) {
    %c0_i32 = arith.constant 0 : i32
    %c0_i32_0 = arith.constant 0 : i32
    %c0_i32_1 = arith.constant 0 : i32
    return %c0_i32, %c0_i32_0 : i32, i32
  }
  func.func @transform_7(%arg0: i32) -> (i32, i32) {
    %c0_i32 = arith.constant 0 : i32
    %c0_i32_0 = arith.constant 0 : i32
    %c0_i32_1 = arith.constant 0 : i32
    return %c0_i32, %c0_i32_0 : i32, i32
  }
  func.func @transform_8(%arg0: i32) -> (i32, i32) {
    %c0_i32 = arith.constant 0 : i32
    %c0_i32_0 = arith.constant 0 : i32
    %c0_i32_1 = arith.constant 0 : i32
    return %c0_i32, %c0_i32_0 : i32, i32
  }
  func.func @transform_9(%arg0: i32) -> (i32, i32) {
    %c0_i32 = arith.constant 0 : i32
    %c0_i32_0 = arith.constant 0 : i32
    %c0_i32_1 = arith.constant 0 : i32
    return %c0_i32, %c0_i32_0 : i32, i32
  }
  func.func @transform_10(%arg0: i32) -> i32 {
    %c0_i32 = arith.constant 0 : i32
    %c0_i32_0 = arith.constant 0 : i32
    return %c0_i32 : i32
  }
  func.func @transform_11(%arg0: i32) -> (i32, i32) {
    %c0_i32 = arith.constant 0 : i32
    %c0_i32_0 = arith.constant 0 : i32
    %c0_i32_1 = arith.constant 0 : i32
    return %c0_i32, %c0_i32_0 : i32, i32
  }
}

</mosaic_0001>

<bundles_post_ra>
// kernel: nlp_net_forward.1
= control target key start
LH: loop header
LB: loop body
LE: loop exit
PB: predicated region body
PF: predicated region fallthrough
CT: control target
= control target key end

     0   :  { %16 = vsyncpa [#allocation4], 0  ;;  %s3690_s0 = inlined_call_operand.vmem [shape: s32[16,1], index: 0, kind: input, shape index: {}]   ;;  %s3691_s1 = inlined_call_operand.hbm [shape: f32[20,32], index: 1, kind: input, shape index: {}]   ;;  %s3692_s2 = inlined_call_operand.vmem [shape: f32[32,256], index: 2, kind: input, shape index: {}]   ;;  %s3693_s3 = inlined_call_operand.vmem [shape: f32[32,128], index: 3, kind: input, shape index: {}]   ;;  %s3694_s4 = inlined_call_operand.hbm [shape: f32[1,256], index: 4, kind: input, shape index: {}]   ;;  %s3695_s5 = inlined_call_operand.hbm [shape: f32[32,256], index: 5, kind: input, shape index: {}]   ;;  %s3696_s6 = inlined_call_operand.hbm [shape: f32[32,128], index: 6, kind: input, shape index: {}]   ;;  %s3697_s7 = inlined_call_operand.vmem [shape: f32[1,256], index: 7, kind: input, shape index: {}]   ;;  %s3698_s8 = inlined_call_operand.vmem [shape: f32[32,5], index: 8, kind: input, shape index: {}]   ;;  %s3699_s9 = inlined_call_operand.hbm [shape: f32[1,5], index: 9, kind: input, shape index: {}]   ;;  %s3700_s10 = inlined_call_operand.hbm [shape: f32[8], index: 10, kind: input, shape index: {}]   ;;  %s3701_s11 = inlined_call_operand.hbm [shape: f32[2,5], index: 11, kind: output, shape index: {}]  }
   0x1   :  { %17 = vsyncpa [#allocation8], 0 }
   0x2   :  { %18 = vsyncpa [#allocation11], 0 }
   0x3   :  { %19 = vsyncpa [#allocation6], 0 }
   0x4   :  { %20 = vsyncpa [#allocation5], 0  ;;  %s3136_s17 = smov [#allocation7]   ;;  %s2984_s21 = scalar_lea.hbm %s3694_s4, 32 }
   0x5   :  { %s45_s18 = sshll.u32 %s3136_s17, 4  ;;  %p2985_p0 = scmp.ne.s32.totalorder %s3694_s4, %s2984_s21  ;;  %s46_s18 = int_to_ptr.vmem [resolvable:$true] %s45_s18 }
   0x6   :  { %p2988_p1 = scmp.lt.u32.totalorder %s2984_s21, %s3694_s4 }
   0x8   :  { %p2990_p2 = pnand %p2988_p1, %p2985_p0 }
   0xa   :  { %2993 = shalt.err (!%p2990_p2)
}
   0xb   :  { %s2994_s26 = scalar_lea.vmem %s46_s18, 32  ;;  %p2999_p4 = scmp.lt.s32.totalorder %s46_s18, %s46_s18 }
   0xc   :  { %p2995_p3 = scmp.ne.s32.totalorder %s46_s18, %s2994_s26  ;;  %p3000_p5 = scmp.lt.s32.totalorder %s2994_s26, %s2994_s26 }
   0xe   :  { %p3001_p6 = por %p3000_p5, %p2999_p4 }
  0x10   :  { %p3002_p7 = pnand %p3001_p6, %p2995_p3 }
  0x12   :  { %3005 = shalt.err (!%p3002_p7)
}
  0x13   :  { %48 = dma.hbm_to_vmem [thread:$0]  %s3694_s4, 32, %s46_s18, [#allocation8]  }
  0x14   :  { %s3137_s29 = smov [#allocation10]   ;;  %s3138_s12 = smov [#allocation3]  }
  0x15   :  { %s66_s30 = sshll.u32 %s3137_s29, 4  ;;  %s28_s13 = sshll.u32 %s3138_s12, 4  ;;  %s67_s30 = int_to_ptr.vmem [resolvable:$true] %s66_s30  ;;  %s29_s13 = int_to_ptr.vmem [resolvable:$true] %s28_s13 }
  0x16   :  { %s3006_s16 = scalar_lea.hbm %s3696_s6, 512 }
  0x17   :  { %p3007_p8 = scmp.ne.s32.totalorder %s3696_s6, %s3006_s16  ;;  %p3010_p9 = scmp.lt.u32.totalorder %s3006_s16, %s3696_s6 }
  0x19   :  { %p3012_p10 = pnand %p3010_p9, %p3007_p8 }
  0x1b   :  { %3015 = shalt.err (!%p3012_p10)
}
  0x1c   :  { %s3016_s4 = scalar_lea.vmem %s67_s30, 512  ;;  %p3021_p12 = scmp.lt.s32.totalorder %s67_s30, %s67_s30 }
  0x1d   :  { %p3017_p11 = scmp.ne.s32.totalorder %s67_s30, %s3016_s4  ;;  %p3022_p13 = scmp.lt.s32.totalorder %s3016_s4, %s3016_s4 }
  0x1f   :  { %p3023_p0 = por %p3022_p13, %p3021_p12 }
  0x21   :  { %p3024_p1 = pnand %p3023_p0, %p3017_p11 }
  0x23   :  { %3027 = shalt.err (!%p3024_p1)
}
  0x24   :  { %s3139_s18 = smov 128   ;;  %s3140_s22 = smov 8  }
  0x25   :  { %72 = dma.hbm_to_vmem [thread:$0]  %s3696_s6, 512, %s67_s30, [#allocation11], %s3139_s18, %s3139_s18, %s3140_s22  }
  0x26   :  { %s3028_s27 = scalar_lea.hbm %s3691_s1, 384 }
  0x27   :  { %p3029_p2 = scmp.ne.s32.totalorder %s3691_s1, %s3028_s27  ;;  %p3032_p3 = scmp.lt.u32.totalorder %s3028_s27, %s3691_s1 }
  0x29   :  { %p3034_p4 = pnand %p3032_p3, %p3029_p2 }
  0x2b   :  { %3037 = shalt.err (!%p3034_p4)
}
  0x2c   :  { %s3038_s15 = scalar_lea.vmem %s29_s13, 384  ;;  %p3043_p6 = scmp.lt.s32.totalorder %s29_s13, %s29_s13 }
  0x2d   :  { %p3039_p5 = scmp.ne.s32.totalorder %s29_s13, %s3038_s15  ;;  %p3044_p7 = scmp.lt.s32.totalorder %s3038_s15, %s3038_s15 }
  0x2f   :  { %p3045_p8 = por %p3044_p7, %p3043_p6 }
  0x31   :  { %p3046_p9 = pnand %p3045_p8, %p3039_p5 }
  0x33   :  { %3049 = shalt.err (!%p3046_p9)
}
  0x34   :  { %34 = dma.hbm_to_vmem [thread:$0]  %s3691_s1, 384, %s29_s13, [#allocation4], %s3139_s18, %s3139_s18, %s3140_s22  }
  0x35   :  { %s3141_s16 = smov [#allocation9]   ;;  %s3050_s21 = scalar_lea.hbm %s3695_s5, 1024 }
  0x36   :  { %s54_s17 = sshll.u32 %s3141_s16, 4  ;;  %p3051_p10 = scmp.ne.s32.totalorder %s3695_s5, %s3050_s21  ;;  %s55_s17 = int_to_ptr.vmem [resolvable:$true] %s54_s17 }
  0x37   :  { %p3054_p11 = scmp.lt.u32.totalorder %s3050_s21, %s3695_s5 }
  0x39   :  { %p3056_p12 = pnand %p3054_p11, %p3051_p10 }
  0x3b   :  { %3059 = shalt.err (!%p3056_p12)
}
  0x3c   :  { %s3060_s26 = scalar_lea.vmem %s55_s17, 1024  ;;  %p3065_p0 = scmp.lt.s32.totalorder %s55_s17, %s55_s17 }
  0x3d   :  { %p3061_p13 = scmp.ne.s32.totalorder %s55_s17, %s3060_s26  ;;  %p3066_p1 = scmp.lt.s32.totalorder %s3060_s26, %s3060_s26 }
  0x3f   :  { %p3067_p2 = por %p3066_p1, %p3065_p0 }
  0x41   :  { %p3068_p3 = pnand %p3067_p2, %p3061_p13 }
  0x43   :  { %3071 = shalt.err (!%p3068_p3)
}
  0x44   :  { %s3142_s1 = smov 256   ;;  %s3143_s13 = smov 16  }
  0x45   :  { %60 = dma.hbm_to_vmem [thread:$0]  %s3695_s5, 1024, %s55_s17, [#allocation8], %s3142_s1, %s3142_s1, %s3143_s13  }
  0x46   :  { %s3144_s27 = smov [#allocation12]   ;;  %s3072_s14 = scalar_lea.hbm %s3699_s9, 16 }
  0x47   :  { %s83_s28 = sshll.u32 %s3144_s27, 4  ;;  %p3073_p4 = scmp.ne.s32.totalorder %s3699_s9, %s3072_s14  ;;  %s84_s28 = int_to_ptr.vmem [resolvable:$true] %s83_s28 }
  0x48   :  { %p3076_p5 = scmp.lt.u32.totalorder %s3072_s14, %s3699_s9 }
  0x4a   :  { %p3078_p6 = pnand %p3076_p5, %p3073_p4 }
  0x4c   :  { %3081 = shalt.err (!%p3078_p6)
}
  0x4d   :  { %s3082_s19 = scalar_lea.vmem %s84_s28, 16  ;;  %s3086_s5 = scalar_lea.vmem %s84_s28, 32 }
  0x4e   :  { %p3083_p7 = scmp.ne.s32.totalorder %s84_s28, %s3082_s19  ;;  %p3087_p8 = scmp.lt.s32.totalorder %s84_s28, %s84_s28 }
  0x4f   :  { %p3088_p9 = scmp.lt.s32.totalorder %s3086_s5, %s3082_s19 }
  0x51   :  { %p3089_p10 = por %p3088_p9, %p3087_p8 }
  0x53   :  { %p3090_p11 = pnand %p3089_p10, %p3083_p7 }
  0x55   :  { %3093 = shalt.err (!%p3090_p11)
}
  0x56   :  { %86 = dma.hbm_to_vmem [thread:$0]  %s3699_s9, 16, %s84_s28, [#allocation11]  }
  0x57   :  { %s3094_s23 = scalar_lea.hbm %s3700_s10, 16 }
  0x58   :  { %p3095_p12 = scmp.ne.s32.totalorder %s3700_s10, %s3094_s23  ;;  %p3098_p13 = scmp.lt.u32.totalorder %s3094_s23, %s3700_s10 }
  0x5a   :  { %p3100_p0 = pnand %p3098_p13, %p3095_p12 }
  0x5c   :  { %3103 = shalt.err (!%p3100_p0)
}
  0x5d   :  { %s3145_s18 = smov [#allocation13]  }
  0x5e   :  { %94 = dma.hbm_to_smem %s3700_s10, 16, %s3145_s18, [#allocation6]  }
  0x5f   :  { %3126 = dma.done.wait [#allocation4], 384  }
  0x60   :  { %3127 = vsyncadd [#allocation4], 4294966912 }
  0x61   :  { %3128 = dma.done.wait [#allocation8], 1056  }
  0x62   :  { %3129 = vsyncadd [#allocation8], 4294966240 }
  0x63   :  { %3130 = dma.done.wait [#allocation11], 528  }
  0x64   :  { %3131 = vsyncadd [#allocation11], 4294966768 }
  0x65   :  { %3132 = dma.done.wait [#allocation6], 16  }
  0x66   :  { %3133 = vsyncadd [#allocation6], 4294967280 }
  0x67   :  { %113 = sfence }
  0x68   :  { %v114_v0 = vld [vmem:[%s3690_s0] sm:$0xff]  ;;  %v130_v1 = vld [vmem:[#allocation3] sm:$0xff]  ;;  %v3146_v2 = vmov 0   ;;  %v131_v3 = vld [vmem:[#allocation3 + $0x8] sm:$0xff]  ;;  %v3147_v6 = vmov 0.0   ;;  %vm140_vm0 = vcmask 1043456   ;;  %v116_v20 = vlaneseq }
  0x69   :  { %2887 = vset.pattern.permute.xlu0 %v3146_v2  ;;  %v2748_v4 = vpack.c.bf16 %v131_v3, %v130_v1  ;;  %v115_v5 = vld [vmem:[%s3690_s0 + $0x8] sm:$0xff]  ;;  %314 = vmatprep.mubr.f32.mxu1 %v3147_v6  ;;  %v132_v7 = vld [vmem:[#allocation3 + $0x10] sm:$0xf]  ;;  %v222_v9 = vld [vmem:[%s3692_s2 + $0x18] sm:$0xff]  ;;  %vm133_vm1 = vcmask 162816   ;;  %v3148_v28 = vmov 0.0|0.0  }
  0x6a   :  { %119 = vperm.xlu0 %2887, %v114_v0   ;;  %v220_v8 = vld [vmem:[%s3692_s2 + $0x8] sm:$0xff]  ;;  %v219_v10 = vld [vmem:[%s3692_s2] sm:$0xff]  ;;  %v221_v12 = vld [vmem:[%s3692_s2 + $0x10] sm:$0xff]  ;;  %v117_v21 = vand.u32 127, %v116_v20  ;;  %vm3149_vm4 = vmmov 0   ;;  %vm243_vm5 = vcmask 261120  }
  0x6b   :  { %2749 = vmatprep.subr.bf16.mxu0 %v2748_v4  ;;  %v2752_v11 = vpack.c.bf16 %v222_v9, %v220_v8  ;;  %v224_v13 = vld [vmem:[%s3692_s2 + $0x28] sm:$0xff]  ;;  %v226_v14 = vld [vmem:[%s3692_s2 + $0x38] sm:$0xff]  ;;  %v2754_v15 = vpack.c.bf16 %v221_v12, %v219_v10  ;;  %v223_v17 = vld [vmem:[%s3692_s2 + $0x20] sm:$0xff]  ;;  %v3359_v37 = vshrl.u32 %v116_v20, 7  ;;  %s3151_s10 = smov 32   ;;  %vm441_vm6 = vcmask 123904  }
  0x6c   :  { %2751 = vmatpush3.bf16.msra.mxu0 %v2748_v4  ;;  %v2756_v16 = vpack.c.bf16 %v226_v14, %v224_v13  ;;  %v225_v18 = vld [vmem:[%s3692_s2 + $0x30] sm:$0xff]  ;;  %v227_v26 = vld [vmem:[%s3693_s3] sm:$0xff]  ;;  %v228_v27 = vld [vmem:[%s3693_s3 + $0x8] sm:$0xff]  ;;  %vm443_vm7 = vcmask 255104   ;;  %vm550_vm8 = vcmask 125954   ;;  %vm552_vm9 = vcmask 257154  }
  0x6d   :  { %2553 = vmatprep.subr.msk.mxu0 %vm140_vm0, %v132_v7  ;;  %2753 = vmatprep.subr.bf16.mxu1 %v2752_v11  ;;  %v2758_v19 = vpack.c.bf16 %v225_v18, %v223_v17  ;;  %v3326_v29 = vpack.c.bf16 %v228_v27, %v227_v26  ;;  %v229_v30 = vld [vmem:[%s3693_s3 + $0x10] sm:$0xff]  ;;  %v230_v31 = vld [vmem:[%s3693_s3 + $0x18] sm:$0xff]  ;;  %v239_v38 = vsub.s32 1, %v3359_v37  ;;  %v231_v39 = vld [vmem:[#allocation7] sm:$0x3]  ;;  %v235_v41 = vsub.s32 0, %v3359_v37 }
  0x6e   :  { %122 = vperm.xlu0 %2887, %v115_v5   ;;  %2755 = vmatpush1.bf16.msra.mxu1 %v2754_v15  ;;  %v3337_v32 = vpack.c.bf16 %v230_v31, %v229_v30  ;;  %s3150_s3 = smov 64   ;;  %vm774_vm10 = vcmask 130054   ;;  %vm776_vm11 = vcmask 261254   ;;  %vm662_vm12 = vcmask 128004   ;;  %s3554_s14 = sld [smem:[#allocation13 + $0x6]] }
  0x6f   :  { %2757 = vmatprep.subr.bf16.mxu1 %v2756_v16  ;;  %v240_v40 = vrot.slane %v231_v39, %v239_v38  ;;  %v236_v45 = vrot.slane %v231_v39, %v235_v41  ;;  %vm664_vm13 = vcmask 259204   ;;  %s3556_s15 = sld [smem:[#allocation13]]  ;;  %s3558_s6 = sld [smem:[#allocation13 + $0x7]]  ;;  %vm2249_vm14 = vcmask 130048  }
  0x70   :  { %2554 = vmatpush3.msk.msra.mxu0 %vm140_vm0, %v132_v7  ;;  %s3584_s30 = sld [smem:[#allocation13 + $0x2]]  ;;  %s3586_s16 = sld [smem:[#allocation13 + $0x5]]  ;;  %vm2405_vm15 = vcmask 33792  }
  0x71   :  { %2760 = vmatprep.subr.bf16.mxu0 %v3148_v28  ;;  %s3606_s0 = sld [smem:[#allocation13 + $0x3]]  ;;  %s3608_s19 = sld [smem:[#allocation13 + $0x4]] }
  0x72   :  { %2759 = vmatpush1.bf16.msra.mxu1 %v2758_v19 }
  0x73   :  { %2766 = vmatprep.subr.bf16.mxu1 %v3148_v28 }
  0xe9   :  { %v120_v22 = vpop.permute.xlu0 %119 }
  0xea   :  { %vm124_vm2 = vcmp.eq.s32.totalorder %v120_v22, %v117_v21 }
  0xeb   :  { %v2425_v23 = vsel %vm124_vm2, 1.0, %v3147_v6 }
  0xec   :  { %2555 = vmatprep.mubr.msk.f32.mxu0 %vm133_vm1, %v2425_v23 }
  0xed   :  { %v123_v24 = vpop.permute.xlu0 %122 }
  0xee   :  { %vm125_vm3 = vcmp.eq.s32.totalorder %v123_v24, %v117_v21 }
  0xef   :  { %v2426_v25 = vsel %vm125_vm3, 1.0, %v3147_v6 }
  0xf0   :  { %2556 = vmatmul.mubr.msk.f32.vlgmr.msra.gmra.mrb[0].mxu0 %vm133_vm1, %v2426_v25 }
  0xf1   :  { %2762 = vmatpush3.bf16.msra.mxu0 %v3326_v29  ;;  %2566 = vmatprep.mubr.msk.f32.mxu0 %vm3149_vm4, %v3147_v6 }
  0xf2   :  { %2763 = vmatprep.subr.bf16.mxu0 %v3148_v28 }
  0xf5   :  { %2765 = vmatpush3.bf16.msra.mxu0 %v3337_v32 }
  0xf6   :  { %2772 = vmatprep.subr.bf16.mxu0 %v3148_v28 }
  0xf8   :  { %2567 = vmatmul.mubr.f32.vlgmr.msra.gmra.mrb[2].mxu0 %v3147_v6 }
  0xf9   :  { %2774 = vmatpush3.bf16.msra.mxu0 %v3326_v29  ;;  %2588 = vmatprep.mubr.msk.f32.mxu0 %vm3149_vm4, %v3147_v6 }
  0xfa   :  { %2775 = vmatprep.subr.bf16.mxu0 %v3148_v28 }
  0xfd   :  { %2777 = vmatpush3.bf16.msra.mxu0 %v3337_v32 }
  0xfe   :  { %2784 = vmatprep.subr.bf16.mxu0 %v3148_v28 }
 0x1c3   :  { %v2557_v33 = vpop.f32.mrb[0].mxu0 }
 0x1c4   :  { %v210_v34 = vpop.f32.mrb[1].mxu0 }
 0x1c5   :  { %2430 = vmatmul.mubr.msk.f32.vlgmr.msra.gmra.mrb[0].mxu1 %vm243_vm5, %v210_v34 }
 0x1c6   :  { %320 = vmatprep.mubr.f32.mxu1 %v3147_v6  ;;  %2768 = vmatpush3.bf16.msra.mxu1 %v3326_v29 }
 0x1c7   :  { %2769 = vmatprep.subr.bf16.mxu1 %v3148_v28 }
 0x1c9   :  { %2431 = vmatmul.mubr.msk.f32.gmra.mrb[2].mxu1 %vm243_vm5, %v2557_v33 }
 0x1ca   :  { %2771 = vmatpush3.bf16.msra.mxu1 %v3337_v32  ;;  %2577 = vmatprep.mubr.msk.f32.mxu1 %vm3149_vm4, %v3147_v6 }
 0x1cb   :  { %2778 = vmatprep.subr.bf16.mxu1 %v3148_v28  ;;  %v410_v35 = vpop.f32.mrb[2].mxu0 }
 0x1cc   :  { %v2568_v36 = vpop.f32.mrb[3].mxu0 }
 0x298   :  { %v316_v42 = vpop.f32.mrb[0].mxu1 }
 0x299   :  { %v318_v43 = vpop.f32.mrb[1].mxu1  ;;  %v317_v54 = vadd.f32 %v316_v42, %v236_v45 }
 0x29a   :  { %v319_v44 = vadd.f32 %v318_v43, %v240_v40 }
 0x29c   :  { %v335_v46 = vrot.slane %v319_v44, 6  ;;  %v338_v47 = vrot.slane %v319_v44, 2  ;;  %v322_v48 = vpop.f32.mrb[2].mxu1 }
 0x29d   :  { %v323_v49 = vadd.f32 %v322_v48, %v236_v45  ;;  %v324_v50 = vpop.f32.mrb[3].mxu1 }
 0x29e   :  { %v325_v51 = vadd.f32 %v324_v50, %v240_v40 }
 0x29f   :  { %v3367_v52 = vadd.f32 %v338_v47, %v323_v49  ;;  %v3369_v53 = vadd.f32 %v335_v46, %v323_v49 }
 0x2a0   :  { %v328_v55 = vrot.slane %v325_v51, 6  ;;  %v331_v56 = vrot.slane %v325_v51, 2 }
 0x2a2   :  { %v3371_v57 = vadd.f32 %v328_v55, %v317_v54  ;;  %v3373_v58 = vadd.f32 %v331_v56, %v317_v54 }
 0x2a4   :  { %v414_v59 = vadd.f32 %v410_v35, %v3371_v57 }
 0x2a6   :  { %2888 = vtanh.f32 %v414_v59  ;;  %v415_v61 = vmul.f32 0.5, %v414_v59 }
 0x2a8   :  { %2890 = vtanh.f32 %v415_v61 }
 0x2b0   :  { %v2889_v60 = vpop.eup %2888 }
 0x2b1   :  { %422 = vrot.lane.b32.xlu1 %v2889_v60, %s3150_s3 }
 0x2b2   :  { %v2891_v62 = vpop.eup %2890 }
 0x2b3   :  { %v417_v63 = vmul.f32 0.5, %v2891_v62 }
 0x2b5   :  { %v418_v0 = vadd.f32 0.5, %v417_v63 }
 0x2b7   :  { %v420_v3 = vmul.f32 0.0, %v418_v0 }
 0x323   :  { %v423_v1 = vpop.permute.xlu1 %422 }
 0x324   :  { %v425_v2 = vmul.f32 %v423_v1, %v418_v0 }
 0x326   :  { %427 = vrot.lane.b32.xlu1 %v425_v2, %s3151_s10 }
 0x398   :  { %v428_v4 = vpop.permute.xlu1 %427 }
 0x399   :  { %v430_v5 = vadd.f32 %v428_v4, %v420_v3 }
 0x39b   :  { %2892 = vtanh.f32 %v430_v5  ;;  %v527_v22 = vrot.slane %v430_v5, 6 }
 0x3a5   :  { %v2893_v7 = vpop.eup %2892 }
 0x3a6   :  { %433 = vrot.lane.b32.xlu0 %v2893_v7, %s3150_s3 }
 0x418   :  { %v434_v8 = vpop.permute.xlu0 %433 }
 0x419   :  { %v436_v9 = vmul.f32 %v434_v8, %v418_v0 }
 0x41b   :  { %438 = vrot.lane.b32.xlu1 %v436_v9, %s3151_s10 }
 0x48d   :  { %v439_v10 = vpop.permute.xlu1 %438 }
 0x48e   :  { %442 = vst.msk [vmem:[#allocation2] sm:$0x3] %vm441_vm6, %v439_v10  ;;  %2578 = vmatmul.mubr.msk.f32.vlgmr.msra.gmra.mrb[4].mxu1 %vm243_vm5, %v439_v10 }
 0x48f   :  { %444 = vst.msk [vmem:[#allocation2 + $0xe] sm:$0x3] %vm443_vm7, %v439_v10  ;;  %2780 = vmatpush3.bf16.msra.mxu1 %v3326_v29  ;;  %2599 = vmatprep.mubr.msk.f32.mxu1 %vm3149_vm4, %v3147_v6 }
 0x490   :  { %2781 = vmatprep.subr.bf16.mxu1 %v3148_v28 }
 0x493   :  { %2783 = vmatpush3.bf16.msra.mxu1 %v3337_v32 }
 0x494   :  { %2790 = vmatprep.subr.bf16.mxu1 %v3148_v28 }
 0x561   :  { %v513_v11 = vpop.f32.mrb[4].mxu1 }
 0x562   :  { %v518_v12 = vrot.slane %v513_v11, 6  ;;  %v2579_v13 = vpop.f32.mrb[5].mxu1 }
 0x564   :  { %v520_v14 = vadd.f32 %v518_v12, %v3373_v58 }
 0x566   :  { %2894 = vtanh.f32 %v520_v14  ;;  %v521_v16 = vmul.f32 0.5, %v520_v14 }
 0x568   :  { %2896 = vtanh.f32 %v521_v16 }
 0x570   :  { %v2895_v15 = vpop.eup %2894 }
 0x571   :  { %531 = vrot.lane.b32.xlu0 %v2895_v15, %s3150_s3 }
 0x572   :  { %v2897_v17 = vpop.eup %2896 }
 0x573   :  { %v523_v18 = vmul.f32 0.5, %v2897_v17 }
 0x575   :  { %v524_v19 = vadd.f32 0.5, %v523_v18 }
 0x577   :  { %v529_v23 = vmul.f32 %v527_v22, %v524_v19 }
 0x5e3   :  { %v532_v20 = vpop.permute.xlu0 %531 }
 0x5e4   :  { %v534_v21 = vmul.f32 %v532_v20, %v524_v19 }
 0x5e6   :  { %536 = vrot.lane.b32.xlu1 %v534_v21, %s3151_s10 }
 0x658   :  { %v537_v24 = vpop.permute.xlu1 %536 }
 0x659   :  { %v539_v25 = vadd.f32 %v537_v24, %v529_v23 }
 0x65b   :  { %2898 = vtanh.f32 %v539_v25  ;;  %v639_v48 = vrot.slane %v539_v25, 6 }
 0x665   :  { %v2899_v26 = vpop.eup %2898 }
 0x666   :  { %542 = vrot.lane.b32.xlu0 %v2899_v26, %s3150_s3 }
 0x6d8   :  { %v543_v27 = vpop.permute.xlu0 %542 }
 0x6d9   :  { %v3393_v30 = vmul.f32 %v543_v27, %v524_v19 }
 0x6db   :  { %v554_v31 = vrot.slane %v3393_v30, 2 }
 0x6dd   :  { %555 = vrot.lane.b32.xlu1 %v554_v31, %s3151_s10 }
 0x74f   :  { %v556_v33 = vpop.permute.xlu1 %555 }
 0x750   :  { %2589 = vmatmul.mubr.msk.f32.vlgmr.msra.gmra.mrb[4].mxu0 %vm243_vm5, %v556_v33 }
 0x751   :  { %2786 = vmatpush3.bf16.msra.mxu0 %v3326_v29  ;;  %2610 = vmatprep.mubr.msk.f32.mxu0 %vm3149_vm4, %v3147_v6 }
 0x752   :  { %2787 = vmatprep.subr.bf16.mxu0 %v3148_v28 }
 0x755   :  { %2789 = vmatpush3.bf16.msra.mxu0 %v3337_v32 }
 0x756   :  { %2796 = vmatprep.subr.bf16.mxu0 %v3148_v28 }
 0x823   :  { %v625_v34 = vpop.f32.mrb[4].mxu0 }
 0x824   :  { %v630_v35 = vrot.slane %v625_v34, 4  ;;  %v2590_v36 = vpop.f32.mrb[5].mxu0 }
 0x826   :  { %v632_v39 = vadd.f32 %v630_v35, %v3371_v57 }
 0x828   :  { %2900 = vtanh.f32 %v632_v39  ;;  %v633_v42 = vmul.f32 0.5, %v632_v39 }
 0x82a   :  { %2902 = vtanh.f32 %v633_v42 }
 0x832   :  { %v2901_v40 = vpop.eup %2900 }
 0x833   :  { %643 = vrot.lane.b32.xlu0 %v2901_v40, %s3150_s3 }
 0x834   :  { %v2903_v43 = vpop.eup %2902 }
 0x835   :  { %v635_v44 = vmul.f32 0.5, %v2903_v43 }
 0x837   :  { %v636_v45 = vadd.f32 0.5, %v635_v44 }
 0x839   :  { %v641_v49 = vmul.f32 %v639_v48, %v636_v45 }
 0x8a5   :  { %v644_v46 = vpop.permute.xlu0 %643 }
 0x8a6   :  { %v646_v47 = vmul.f32 %v644_v46, %v636_v45 }
 0x8a8   :  { %648 = vrot.lane.b32.xlu1 %v646_v47, %s3151_s10 }
 0x91a   :  { %v649_v50 = vpop.permute.xlu1 %648 }
 0x91b   :  { %v651_v51 = vadd.f32 %v649_v50, %v641_v49 }
 0x91d   :  { %2904 = vtanh.f32 %v651_v51  ;;  %v751_v8 = vrot.slane %v651_v51, 6 }
 0x927   :  { %v2905_v54 = vpop.eup %2904 }
 0x928   :  { %654 = vrot.lane.b32.xlu0 %v2905_v54, %s3150_s3 }
 0x99a   :  { %v655_v55 = vpop.permute.xlu0 %654 }
 0x99b   :  { %v3408_v56 = vmul.f32 %v655_v55, %v636_v45 }
 0x99d   :  { %v666_v57 = vrot.slane %v3408_v56, 4 }
 0x99f   :  { %667 = vrot.lane.b32.xlu1 %v666_v57, %s3151_s10 }
 0xa11   :  { %v668_v59 = vpop.permute.xlu1 %667 }
 0xa12   :  { %2600 = vmatmul.mubr.msk.f32.vlgmr.msra.gmra.mrb[6].mxu1 %vm243_vm5, %v668_v59 }
 0xa13   :  { %2792 = vmatpush3.bf16.msra.mxu1 %v3326_v29  ;;  %2621 = vmatprep.mubr.msk.f32.mxu1 %vm3149_vm4, %v3147_v6 }
 0xa14   :  { %2793 = vmatprep.subr.bf16.mxu1 %v3148_v28 }
 0xa17   :  { %2795 = vmatpush3.bf16.msra.mxu1 %v3337_v32 }
 0xa18   :  { %2802 = vmatprep.subr.bf16.mxu1 %v3148_v28 }
 0xae5   :  { %v737_v60 = vpop.f32.mrb[6].mxu1 }
 0xae6   :  { %v742_v61 = vrot.slane %v737_v60, 2  ;;  %v2601_v62 = vpop.f32.mrb[7].mxu1 }
 0xae8   :  { %v744_v63 = vadd.f32 %v742_v61, %v3373_v58 }
 0xaea   :  { %2906 = vtanh.f32 %v744_v63  ;;  %v745_v1 = vmul.f32 0.5, %v744_v63 }
 0xaec   :  { %2908 = vtanh.f32 %v745_v1 }
 0xaf4   :  { %v2907_v0 = vpop.eup %2906 }
 0xaf5   :  { %755 = vrot.lane.b32.xlu0 %v2907_v0, %s3150_s3 }
 0xaf6   :  { %v2909_v2 = vpop.eup %2908 }
 0xaf7   :  { %v747_v3 = vmul.f32 0.5, %v2909_v2 }
 0xaf9   :  { %v748_v4 = vadd.f32 0.5, %v747_v3 }
 0xafb   :  { %v753_v9 = vmul.f32 %v751_v8, %v748_v4 }
 0xb67   :  { %v756_v5 = vpop.permute.xlu0 %755 }
 0xb68   :  { %v758_v7 = vmul.f32 %v756_v5, %v748_v4 }
 0xb6a   :  { %760 = vrot.lane.b32.xlu1 %v758_v7, %s3151_s10 }
 0xbdc   :  { %v761_v10 = vpop.permute.xlu1 %760 }
 0xbdd   :  { %v763_v11 = vadd.f32 %v761_v10, %v753_v9 }
 0xbdf   :  { %2910 = vtanh.f32 %v763_v11  ;;  %v860_v26 = vrot.slane %v763_v11, 6 }
 0xbe9   :  { %v2911_v12 = vpop.eup %2910 }
 0xbea   :  { %766 = vrot.lane.b32.xlu0 %v2911_v12, %s3150_s3 }
 0xc5c   :  { %v767_v58 = vpop.permute.xlu0 %766 }
 0xc5d   :  { %v3423_v13 = vmul.f32 %v767_v58, %v748_v4 }
 0xc5f   :  { %v778_v14 = vrot.slane %v3423_v13, 6 }
 0xc61   :  { %779 = vrot.lane.b32.xlu1 %v778_v14, %s3151_s10 }
 0xcd3   :  { %v780_v15 = vpop.permute.xlu1 %779 }
 0xcd4   :  { %2611 = vmatmul.mubr.msk.f32.vlgmr.msra.gmra.mrb[6].mxu0 %vm243_vm5, %v780_v15 }
 0xcd5   :  { %2798 = vmatpush3.bf16.msra.mxu0 %v3326_v29  ;;  %2632 = vmatprep.mubr.msk.f32.mxu0 %vm3149_vm4, %v3147_v6 }
 0xcd6   :  { %2799 = vmatprep.subr.bf16.mxu0 %v3148_v28 }
 0xcd9   :  { %2801 = vmatpush3.bf16.msra.mxu0 %v3337_v32 }
 0xda7   :  { %v849_v16 = vpop.f32.mrb[6].mxu0 }
 0xda8   :  { %v853_v17 = vadd.f32 %v849_v16, %v3369_v53  ;;  %v2612_v18 = vpop.f32.mrb[7].mxu0 }
 0xdaa   :  { %2912 = vtanh.f32 %v853_v17  ;;  %v854_v20 = vmul.f32 0.5, %v853_v17 }
 0xdac   :  { %2914 = vtanh.f32 %v854_v20 }
 0xdb4   :  { %v2913_v19 = vpop.eup %2912 }
 0xdb5   :  { %864 = vrot.lane.b32.xlu0 %v2913_v19, %s3150_s3 }
 0xdb6   :  { %v2915_v21 = vpop.eup %2914 }
 0xdb7   :  { %v856_v22 = vmul.f32 0.5, %v2915_v21 }
 0xdb9   :  { %v857_v23 = vadd.f32 0.5, %v856_v22 }
 0xdbb   :  { %v862_v27 = vmul.f32 %v860_v26, %v857_v23 }
 0xe27   :  { %v865_v24 = vpop.permute.xlu0 %864 }
 0xe28   :  { %v867_v25 = vmul.f32 %v865_v24, %v857_v23 }
 0xe2a   :  { %869 = vrot.lane.b32.xlu1 %v867_v25, %s3151_s10 }
 0xe9c   :  { %v870_v31 = vpop.permute.xlu1 %869 }
 0xe9d   :  { %v872_v33 = vadd.f32 %v870_v31, %v862_v27 }
 0xe9f   :  { %2916 = vtanh.f32 %v872_v33 }
 0xea9   :  { %v2917_v34 = vpop.eup %2916 }
 0xeaa   :  { %875 = vrot.lane.b32.xlu0 %v2917_v34, %s3150_s3 }
 0xf1c   :  { %v876_v35 = vpop.permute.xlu0 %875 }
 0xf1d   :  { %v878_v36 = vmul.f32 %v876_v35, %v857_v23 }
 0xf1f   :  { %880 = vrot.lane.b32.xlu1 %v878_v36, %s3151_s10 }
 0xf91   :  { %v3438_v39 = vpop.permute.xlu1 %880 }
 0xf92   :  { %2622 = vmatmul.mubr.msk.f32.vlgmr.msra.gmra.mrb[8].mxu1 %vm243_vm5, %v3438_v39 }
 0xf93   :  { %2804 = vmatpush3.bf16.msra.mxu1 %v3326_v29  ;;  %2643 = vmatprep.mubr.msk.f32.mxu1 %vm3149_vm4, %v3147_v6 }
 0xf94   :  { %2805 = vmatprep.subr.bf16.mxu1 %v3148_v28 }
 0xf97   :  { %2807 = vmatpush3.bf16.msra.mxu1 %v3337_v32  ;;  %v967_v32 = vrot.slane %v872_v33, 6 }
 0xf98   :  { %2816 = vmatprep.subr.bf16.mxu1 %v3148_v28 }
0x1065   :  { %v953_v40 = vpop.f32.mrb[8].mxu1 }
0x1066   :  { %v958_v42 = vrot.slane %v953_v40, 6  ;;  %v2623_v43 = vpop.f32.mrb[9].mxu1 }
0x1067   :  { %v1213_v43 = vld [vmem:[#allocation9 + $0x8] sm:$0xff] }
0x1068   :  { %v960_v44 = vadd.f32 %v958_v42, %v3367_v52 }
0x106a   :  { %2918 = vtanh.f32 %v960_v44  ;;  %v961_v46 = vmul.f32 0.5, %v960_v44  ;;  %v1215_v44 = vld [vmem:[#allocation9 + $0x18] sm:$0xff] }
0x106c   :  { %2920 = vtanh.f32 %v961_v46  ;;  %v1214_v46 = vld [vmem:[#allocation9 + $0x10] sm:$0xff] }
0x1074   :  { %v2919_v45 = vpop.eup %2918 }
0x1075   :  { %971 = vrot.lane.b32.xlu0 %v2919_v45, %s3150_s3  ;;  %v2808_v45 = vpack.c.bf16 %v1215_v44, %v1213_v43 }
0x1076   :  { %v2921_v29 = vpop.eup %2920 }
0x1077   :  { %v963_v47 = vmul.f32 0.5, %v2921_v29  ;;  %2809 = vmatprep.subr.bf16.mxu0 %v2808_v45 }
0x1079   :  { %v964_v48 = vadd.f32 0.5, %v963_v47  ;;  %v1217_v47 = vld [vmem:[#allocation9 + $0x28] sm:$0xff] }
0x107b   :  { %v969_v51 = vmul.f32 %v967_v32, %v964_v48  ;;  %v1218_v32 = vld [vmem:[#allocation9 + $0x30] sm:$0xff] }
0x10e7   :  { %v972_v49 = vpop.permute.xlu0 %971 }
0x10e8   :  { %v974_v50 = vmul.f32 %v972_v49, %v964_v48  ;;  %v1216_v49 = vld [vmem:[#allocation9 + $0x20] sm:$0xff] }
0x10ea   :  { %976 = vrot.lane.b32.xlu1 %v974_v50, %s3151_s10 }
0x115c   :  { %v977_v54 = vpop.permute.xlu1 %976 }
0x115d   :  { %v979_v55 = vadd.f32 %v977_v54, %v969_v51  ;;  %v2814_v51 = vpack.c.bf16 %v1218_v32, %v1216_v49  ;;  %v1221_v54 = vld [vmem:[#allocation10 + $0x8] sm:$0xff] }
0x115f   :  { %2922 = vtanh.f32 %v979_v55  ;;  %v1077_v11 = vrot.slane %v979_v55, 6 }
0x1169   :  { %v2923_v57 = vpop.eup %2922 }
0x116a   :  { %982 = vrot.lane.b32.xlu0 %v2923_v57, %s3150_s3 }
0x11dc   :  { %v983_v59 = vpop.permute.xlu0 %982 }
0x11dd   :  { %v3452_v60 = vmul.f32 %v983_v59, %v964_v48  ;;  %v1219_v48 = vld [vmem:[#allocation9 + $0x38] sm:$0xff] }
0x11de   :  { %v2812_v50 = vpack.c.bf16 %v1219_v48, %v1217_v47 }
0x11df   :  { %v992_v61 = vrot.slane %v3452_v60, 2 }
0x11e1   :  { %993 = vrot.lane.b32.xlu1 %v992_v61, %s3151_s10  ;;  %v1223_v61 = vld [vmem:[#allocation10 + $0x18] sm:$0xff] }
0x1253   :  { %v994_v62 = vpop.permute.xlu1 %993 }
0x1254   :  { %2633 = vmatmul.mubr.msk.f32.vlgmr.msra.gmra.mrb[8].mxu0 %vm243_vm5, %v994_v62 }
0x1255   :  { %1308 = vmatprep.mubr.f32.mxu0 %v3147_v6 }
0x1327   :  { %v1063_v63 = vpop.f32.mrb[8].mxu0 }
0x1328   :  { %v1068_v0 = vrot.slane %v1063_v63, 4  ;;  %v2634_v1 = vpop.f32.mrb[9].mxu0 }
0x132a   :  { %v1070_v2 = vadd.f32 %v1068_v0, %v3369_v53 }
0x132c   :  { %2924 = vtanh.f32 %v1070_v2  ;;  %v1071_v4 = vmul.f32 0.5, %v1070_v2 }
0x132e   :  { %2926 = vtanh.f32 %v1071_v4 }
0x1336   :  { %v2925_v3 = vpop.eup %2924 }
0x1337   :  { %1081 = vrot.lane.b32.xlu0 %v2925_v3, %s3150_s3 }
0x1338   :  { %v2927_v5 = vpop.eup %2926 }
0x1339   :  { %v1073_v7 = vmul.f32 0.5, %v2927_v5 }
0x133b   :  { %v1074_v8 = vadd.f32 0.5, %v1073_v7  ;;  %v1224_v7 = vld [vmem:[%s3697_s7] sm:$0x3]  ;;  %s3552_s7 = sld [smem:[#allocation13 + $0x1]] }
0x133d   :  { %v1079_v12 = vmul.f32 %v1077_v11, %v1074_v8 }
0x13a9   :  { %v1082_v9 = vpop.permute.xlu0 %1081 }
0x13aa   :  { %v1084_v10 = vmul.f32 %v1082_v9, %v1074_v8 }
0x13ac   :  { %1086 = vrot.lane.b32.xlu1 %v1084_v10, %s3151_s10 }
0x141e   :  { %v1087_v58 = vpop.permute.xlu1 %1086 }
0x141f   :  { %v1089_v14 = vadd.f32 %v1087_v58, %v1079_v12  ;;  %v1231_v12 = vrot.slane %v1224_v7, %v235_v41 }
0x1421   :  { %2928 = vtanh.f32 %v1089_v14 }
0x142b   :  { %v2929_v15 = vpop.eup %2928 }
0x142c   :  { %1092 = vrot.lane.b32.xlu0 %v2929_v15, %s3150_s3 }
0x149e   :  { %v1093_v53 = vpop.permute.xlu0 %1092 }
0x149f   :  { %v1095_v16 = vmul.f32 %v1093_v53, %v1074_v8  ;;  %v1235_v8 = vrot.slane %v1224_v7, %v239_v38 }
0x14a1   :  { %v1102_v17 = vrot.slane %v1095_v16, 4 }
0x14a3   :  { %1103 = vrot.lane.b32.xlu1 %v1102_v17, %s3151_s10 }
0x1515   :  { %v1104_v18 = vpop.permute.xlu1 %1103 }
0x1516   :  { %2644 = vmatmul.mubr.msk.f32.vlgmr.msra.gmra.mrb[10].mxu1 %vm243_vm5, %v1104_v18 }
0x1517   :  { %2654 = vmatprep.mubr.msk.f32.mxu1 %vm3149_vm4, %v3147_v6 }
0x15e9   :  { %v1173_v19 = vpop.f32.mrb[10].mxu1 }
0x15ea   :  { %v1178_v20 = vrot.slane %v1173_v19, 2  ;;  %v2645_v21 = vpop.f32.mrb[11].mxu1 }
0x15ec   :  { %v1180_v22 = vadd.f32 %v1178_v20, %v3367_v52  ;;  %v1187_v52 = vrot.slane %v1089_v14, 6 }
0x15ee   :  { %2930 = vtanh.f32 %v1180_v22  ;;  %v1181_v24 = vmul.f32 0.5, %v1180_v22 }
0x15f0   :  { %2932 = vtanh.f32 %v1181_v24 }
0x15f8   :  { %v2931_v23 = vpop.eup %2930 }
0x15f9   :  { %1191 = vrot.lane.b32.xlu0 %v2931_v23, %s3150_s3 }
0x15fa   :  { %v2933_v25 = vpop.eup %2932 }
0x15fb   :  { %v1183_v26 = vmul.f32 0.5, %v2933_v25 }
0x15fd   :  { %v1184_v27 = vadd.f32 0.5, %v1183_v26 }
0x15ff   :  { %v1189_v34 = vmul.f32 %v1187_v52, %v1184_v27 }
0x166b   :  { %v1192_v31 = vpop.permute.xlu0 %1191 }
0x166c   :  { %v1194_v33 = vmul.f32 %v1192_v31, %v1184_v27 }
0x166e   :  { %1196 = vrot.lane.b32.xlu1 %v1194_v33, %s3151_s10 }
0x1672   :  { %547 = vrot.lane.b32.xlu1 %v3393_v30, %s3151_s10 }
0x1676   :  { %771 = vrot.lane.b32.xlu1 %v3423_v13, %s3151_s10 }
0x167a   :  { %1097 = vrot.lane.b32.xlu1 %v1095_v16, %s3151_s10 }
0x16e0   :  { %v1197_v35 = vpop.permute.xlu1 %1196 }
0x16e1   :  { %v1199_v36 = vadd.f32 %v1197_v35, %v1189_v34 }
0x16e3   :  { %2934 = vtanh.f32 %v1199_v36 }
0x16e4   :  { %v548_v40 = vpop.permute.xlu1 %547 }
0x16e5   :  { %551 = vst.msk [vmem:[#allocation2] sm:$0xc] %vm550_vm8, %v548_v40 }
0x16e6   :  { %553 = vst.msk [vmem:[#allocation2 + $0xa] sm:$0xc] %vm552_vm9, %v548_v40 }
0x16e8   :  { %v772_v30 = vpop.permute.xlu1 %771 }
0x16e9   :  { %775 = vst.msk [vmem:[#allocation2] sm:$0xc0] %vm774_vm10, %v772_v30 }
0x16ea   :  { %777 = vst.msk [vmem:[#allocation2 + $0x2] sm:$0xc0] %vm776_vm11, %v772_v30 }
0x16eb   :  { %883 = vst.msk [vmem:[#allocation2 + $0x8] sm:$0x3] %vm441_vm6, %v3438_v39 }
0x16ec   :  { %884 = vst.msk [vmem:[#allocation2 + $0x6] sm:$0x3] %vm443_vm7, %v3438_v39  ;;  %v1098_v13 = vpop.permute.xlu1 %1097  ;;  %v1212_v39 = vld [vmem:[#allocation9] sm:$0xff] }
0x16ed   :  { %v2935_v42 = vpop.eup %2934  ;;  %1100 = vst.msk [vmem:[#allocation2 + $0x8] sm:$0x30] %vm662_vm12, %v1098_v13  ;;  %v2810_v29 = vpack.c.bf16 %v1214_v46, %v1212_v39 }
0x16ee   :  { %1101 = vst.msk [vmem:[#allocation2 - $0x2] sm:$0x30] %vm664_vm13, %v1098_v13  ;;  %1202 = vrot.lane.b32.xlu0 %v2935_v42, %s3150_s3 }
0x16ef   :  { %2811 = vmatpush1.bf16.msra.mxu0 %v2810_v29 }
0x16f0   :  { %2813 = vmatprep.subr.bf16.mxu0 %v2812_v50 }
0x16f2   :  { %659 = vrot.lane.b32.xlu0 %v3408_v56, %s3151_s10  ;;  %v1220_v56 = vld [vmem:[#allocation10] sm:$0xff] }
0x16f3   :  { %2815 = vmatpush1.bf16.msra.mxu0 %v2814_v51  ;;  %v3490_v55 = vpack.c.bf16 %v1221_v54, %v1220_v56 }
0x16f4   :  { %2822 = vmatprep.subr.bf16.mxu0 %v3148_v28 }
0x16f5   :  { %2818 = vmatpush3.bf16.msra.mxu1 %v3490_v55 }
0x16f6   :  { %987 = vrot.lane.b32.xlu0 %v3452_v60, %s3151_s10  ;;  %2819 = vmatprep.subr.bf16.mxu1 %v3148_v28  ;;  %v1222_v60 = vld [vmem:[#allocation10 + $0x10] sm:$0xff] }
0x16f7   :  { %v3495_v62 = vpack.c.bf16 %v1223_v61, %v1222_v60  ;;  %v1548_v60 = vstv %s3554_s14 }
0x16f9   :  { %2821 = vmatpush3.bf16.msra.mxu1 %v3495_v62 }
0x16fa   :  { %2828 = vmatprep.subr.bf16.mxu1 %v3148_v28 }
0x16fc   :  { %2655 = vmatmul.mubr.f32.vlgmr.msra.gmra.mrb[12].mxu1 %v3147_v6 }
0x16fd   :  { %2830 = vmatpush3.bf16.msra.mxu1 %v3490_v55  ;;  %2676 = vmatprep.mubr.msk.f32.mxu1 %vm3149_vm4, %v3147_v6 }
0x16fe   :  { %2831 = vmatprep.subr.bf16.mxu1 %v3148_v28 }
0x1701   :  { %2833 = vmatpush3.bf16.msra.mxu1 %v3495_v62 }
0x1702   :  { %2840 = vmatprep.subr.bf16.mxu1 %v3148_v28 }
0x1760   :  { %v1203_v57 = vpop.permute.xlu0 %1202 }
0x1761   :  { %v1205_v59 = vmul.f32 %v1203_v57, %v1184_v27 }
0x1763   :  { %1207 = vrot.lane.b32.xlu0 %v1205_v59, %s3151_s10  ;;  %v1541_v59 = vstv %s3552_s7 }
0x1764   :  { %v660_v63 = vpop.permute.xlu0 %659 }
0x1765   :  { %663 = vst.msk [vmem:[#allocation2] sm:$0x30] %vm662_vm12, %v660_v63 }
0x1766   :  { %665 = vst.msk [vmem:[#allocation2 + $0x6] sm:$0x30] %vm664_vm13, %v660_v63 }
0x1768   :  { %v988_v0 = vpop.permute.xlu0 %987 }
0x1769   :  { %990 = vst.msk [vmem:[#allocation2 + $0x8] sm:$0xc] %vm550_vm8, %v988_v0 }
0x176a   :  { %991 = vst.msk [vmem:[#allocation2 + $0x2] sm:$0xc] %vm552_vm9, %v988_v0  ;;  %v1429_v0 = vstv %s3556_s15 }
0x17cf   :  { %v1401_v4 = vpop.f32.mrb[12].mxu1 }
0x17d0   :  { %v2656_v5 = vpop.f32.mrb[13].mxu1 }
0x17d5   :  { %v1208_v1 = vpop.permute.xlu0 %1207 }
0x17d6   :  { %1210 = vst.msk [vmem:[#allocation2 + $0x8] sm:$0xc0] %vm774_vm10, %v1208_v1 }
0x17d7   :  { %1211 = vst.msk [vmem:[#allocation2 - $0x6] sm:$0xc0] %vm776_vm11, %v1208_v1  ;;  %v1433_v1 = vstv %s3558_s6 }
0x17dd   :  { %v1226_v3 = vld [vmem:[#allocation2 + $0x8] sm:$0xff] }
0x17de   :  { %v1225_v2 = vld [vmem:[#allocation2] sm:$0xff] }
0x17df   :  { %2439 = vmatmul.mubr.msk.f32.vlgmr.msra.gmra.mrb[10].mxu0 %vm243_vm5, %v1225_v2 }
0x17e0   :  { %1314 = vmatprep.mubr.f32.mxu0 %v3147_v6  ;;  %2824 = vmatpush3.bf16.msra.mxu0 %v3490_v55 }
0x17e1   :  { %2825 = vmatprep.subr.bf16.mxu0 %v3148_v28 }
0x17e3   :  { %2440 = vmatmul.mubr.msk.f32.gmra.mrb[12].mxu0 %vm243_vm5, %v1226_v3 }
0x17e4   :  { %2827 = vmatpush3.bf16.msra.mxu0 %v3495_v62  ;;  %2665 = vmatprep.mubr.msk.f32.mxu0 %vm3149_vm4, %v3147_v6 }
0x17e5   :  { %2834 = vmatprep.subr.bf16.mxu0 %v3148_v28 }
0x18b2   :  { %v1310_v9 = vpop.f32.mrb[10].mxu0 }
0x18b3   :  { %v1312_v10 = vpop.f32.mrb[11].mxu0  ;;  %v1311_v20 = vadd.f32 %v1310_v9, %v1231_v12 }
0x18b4   :  { %v1313_v11 = vadd.f32 %v1312_v10, %v1235_v8 }
0x18b6   :  { %v1329_v58 = vrot.slane %v1313_v11, 6  ;;  %v1332_v14 = vrot.slane %v1313_v11, 2  ;;  %v1316_v15 = vpop.f32.mrb[12].mxu0 }
0x18b7   :  { %v1317_v53 = vadd.f32 %v1316_v15, %v1231_v12  ;;  %v1318_v16 = vpop.f32.mrb[13].mxu0 }
0x18b8   :  { %v1319_v17 = vadd.f32 %v1318_v16, %v1235_v8 }
0x18b9   :  { %v3528_v18 = vadd.f32 %v1332_v14, %v1317_v53  ;;  %v3530_v19 = vadd.f32 %v1329_v58, %v1317_v53 }
0x18ba   :  { %v1322_v21 = vrot.slane %v1319_v17, 6  ;;  %v1325_v22 = vrot.slane %v1319_v17, 2 }
0x18bc   :  { %v3532_v38 = vadd.f32 %v1322_v21, %v1311_v20  ;;  %v3534_v23 = vadd.f32 %v1325_v22, %v1311_v20 }
0x18be   :  { %v1405_v37 = vadd.f32 %v1401_v4, %v3532_v38 }
0x18c0   :  { %2936 = vtanh.f32 %v1405_v37  ;;  %v1406_v24 = vmul.f32 0.5, %v1405_v37 }
0x18c2   :  { %2938 = vtanh.f32 %v1406_v24 }
0x18ca   :  { %v2937_v41 = vpop.eup %2936 }
0x18cb   :  { %1413 = vrot.lane.b32.xlu1 %v2937_v41, %s3150_s3 }
0x18cc   :  { %v2939_v25 = vpop.eup %2938 }
0x18cd   :  { %v1408_v26 = vmul.f32 0.5, %v2939_v25 }
0x18cf   :  { %v1409_v27 = vadd.f32 0.5, %v1408_v26 }
0x18d1   :  { %v1411_v52 = vmul.f32 0.0, %v1409_v27 }
0x193d   :  { %v1414_v31 = vpop.permute.xlu1 %1413 }
0x193e   :  { %v1416_v33 = vmul.f32 %v1414_v31, %v1409_v27 }
0x1940   :  { %1418 = vrot.lane.b32.xlu0 %v1416_v33, %s3151_s10  ;;  %v1667_v33 = vstv %s3586_s16 }
0x19b2   :  { %v1419_v34 = vpop.permute.xlu0 %1418 }
0x19b3   :  { %v1421_v35 = vadd.f32 %v1419_v34, %v1411_v52 }
0x19b5   :  { %2940 = vtanh.f32 %v1421_v35  ;;  %v1521_v32 = vrot.slane %v1421_v35, 6 }
0x19bf   :  { %v2941_v36 = vpop.eup %2940 }
0x19c0   :  { %1424 = vrot.lane.b32.xlu1 %v2941_v36, %s3150_s3 }
0x1a32   :  { %v1425_v40 = vpop.permute.xlu1 %1424 }
0x1a33   :  { %v1427_v30 = vmul.f32 %v1425_v40, %v1409_v27 }
0x1a35   :  { %1437 = vrot.lane.b32.xlu0 %v1427_v30, %s3151_s10  ;;  %v1430_v8 = vmul.f32 %v1429_v0, %v1427_v30  ;;  %v1434_v9 = vmul.f32 %v1433_v1, %v1427_v30 }
0x1aa7   :  { %v1438_v13 = vpop.permute.xlu0 %1437 }
0x1aa8   :  { %2666 = vmatmul.mubr.msk.f32.vlgmr.msra.gmra.mrb[14].mxu0 %vm243_vm5, %v1438_v13 }
0x1aa9   :  { %2836 = vmatpush3.bf16.msra.mxu0 %v3490_v55  ;;  %2687 = vmatprep.mubr.msk.f32.mxu0 %vm3149_vm4, %v3147_v6 }
0x1aaa   :  { %2837 = vmatprep.subr.bf16.mxu0 %v3148_v28 }
0x1aad   :  { %2839 = vmatpush3.bf16.msra.mxu0 %v3495_v62 }
0x1aae   :  { %2846 = vmatprep.subr.bf16.mxu0 %v3148_v28 }
0x1b7b   :  { %v1507_v42 = vpop.f32.mrb[14].mxu0 }
0x1b7c   :  { %v1512_v43 = vrot.slane %v1507_v42, 6  ;;  %v2667_v44 = vpop.f32.mrb[15].mxu0 }
0x1b7e   :  { %v1514_v45 = vadd.f32 %v1512_v43, %v3534_v23 }
0x1b80   :  { %2942 = vtanh.f32 %v1514_v45  ;;  %v1515_v46 = vmul.f32 0.5, %v1514_v45 }
0x1b82   :  { %2944 = vtanh.f32 %v1515_v46 }
0x1b8a   :  { %v2943_v39 = vpop.eup %2942 }
0x1b8b   :  { %1525 = vrot.lane.b32.xlu1 %v2943_v39, %s3150_s3 }
0x1b8c   :  { %v2945_v29 = vpop.eup %2944 }
0x1b8d   :  { %v1517_v47 = vmul.f32 0.5, %v2945_v29 }
0x1b8f   :  { %v1518_v48 = vadd.f32 0.5, %v1517_v47 }
0x1b91   :  { %v1523_v51 = vmul.f32 %v1521_v32, %v1518_v48 }
0x1bfd   :  { %v1526_v49 = vpop.permute.xlu1 %1525 }
0x1bfe   :  { %v1528_v50 = vmul.f32 %v1526_v49, %v1518_v48 }
0x1c00   :  { %1530 = vrot.lane.b32.xlu0 %v1528_v50, %s3151_s10 }
0x1c72   :  { %v1531_v56 = vpop.permute.xlu0 %1530 }
0x1c73   :  { %v1533_v54 = vadd.f32 %v1531_v56, %v1523_v51 }
0x1c75   :  { %2946 = vtanh.f32 %v1533_v54  ;;  %v1640_v24 = vrot.slane %v1533_v54, 6 }
0x1c7f   :  { %v2947_v57 = vpop.eup %2946 }
0x1c80   :  { %1536 = vrot.lane.b32.xlu1 %v2947_v57, %s3150_s3 }
0x1cf2   :  { %v1537_v61 = vpop.permute.xlu1 %1536 }
0x1cf3   :  { %v1539_v63 = vmul.f32 %v1537_v61, %v1518_v48 }
0x1cf5   :  { %v1542_v2 = vmul.f32 %v1541_v59, %v1539_v63  ;;  %v1549_v3 = vmul.f32 %v1548_v60, %v1539_v63  ;;  %v1555_v4 = vrot.slane %v1539_v63, 2 }
0x1cf7   :  { %v1544_v5 = vrot.slane %v1542_v2, 2  ;;  %v1551_v7 = vrot.slane %v1549_v3, 2  ;;  %1556 = vrot.lane.b32.xlu0 %v1555_v4, %s3151_s10  ;;  %v1786_v3 = vstv %s3608_s19 }
0x1cf9   :  { %v1546_v10 = vadd.f32 %v1544_v5, %v1430_v8  ;;  %v1553_v11 = vadd.f32 %v1551_v7, %v1434_v9 }
0x1d69   :  { %v1557_v12 = vpop.permute.xlu0 %1556 }
0x1d6a   :  { %2677 = vmatmul.mubr.msk.f32.vlgmr.msra.gmra.mrb[14].mxu1 %vm243_vm5, %v1557_v12 }
0x1d6b   :  { %2842 = vmatpush3.bf16.msra.mxu1 %v3490_v55  ;;  %2698 = vmatprep.mubr.msk.f32.mxu1 %vm3149_vm4, %v3147_v6 }
0x1d6c   :  { %2843 = vmatprep.subr.bf16.mxu1 %v3148_v28 }
0x1d6f   :  { %2845 = vmatpush3.bf16.msra.mxu1 %v3495_v62 }
0x1d70   :  { %2852 = vmatprep.subr.bf16.mxu1 %v3148_v28 }
0x1e3d   :  { %v1626_v58 = vpop.f32.mrb[14].mxu1 }
0x1e3e   :  { %v1631_v14 = vrot.slane %v1626_v58, 4  ;;  %v2678_v15 = vpop.f32.mrb[15].mxu1 }
0x1e40   :  { %v1633_v53 = vadd.f32 %v1631_v14, %v3532_v38  ;;  %v1660_v38 = vstv %s3584_s30 }
0x1e42   :  { %2948 = vtanh.f32 %v1633_v53  ;;  %v1634_v17 = vmul.f32 0.5, %v1633_v53 }
0x1e44   :  { %2950 = vtanh.f32 %v1634_v17 }
0x1e4c   :  { %v2949_v16 = vpop.eup %2948 }
0x1e4d   :  { %1644 = vrot.lane.b32.xlu1 %v2949_v16, %s3150_s3 }
0x1e4e   :  { %v2951_v20 = vpop.eup %2950 }
0x1e4f   :  { %v1636_v21 = vmul.f32 0.5, %v2951_v20 }
0x1e51   :  { %v1637_v22 = vadd.f32 0.5, %v1636_v21 }
0x1e53   :  { %v1642_v25 = vmul.f32 %v1640_v24, %v1637_v22 }
0x1ebf   :  { %v1645_v37 = vpop.permute.xlu1 %1644 }
0x1ec0   :  { %v1647_v41 = vmul.f32 %v1645_v37, %v1637_v22 }
0x1ec2   :  { %1649 = vrot.lane.b32.xlu0 %v1647_v41, %s3151_s10 }
0x1f34   :  { %v1650_v26 = vpop.permute.xlu0 %1649 }
0x1f35   :  { %v1652_v27 = vadd.f32 %v1650_v26, %v1642_v25 }
0x1f37   :  { %2952 = vtanh.f32 %v1652_v27  ;;  %v1759_v54 = vrot.slane %v1652_v27, 6 }
0x1f41   :  { %v2953_v31 = vpop.eup %2952 }
0x1f42   :  { %1655 = vrot.lane.b32.xlu1 %v2953_v31, %s3150_s3 }
0x1fb4   :  { %v1656_v52 = vpop.permute.xlu1 %1655 }
0x1fb5   :  { %v1658_v34 = vmul.f32 %v1656_v52, %v1637_v22 }
0x1fb7   :  { %v1661_v35 = vmul.f32 %v1660_v38, %v1658_v34  ;;  %v1668_v36 = vmul.f32 %v1667_v33, %v1658_v34  ;;  %v1674_v40 = vrot.slane %v1658_v34, 4 }
0x1fb9   :  { %v1663_v30 = vrot.slane %v1661_v35, 4  ;;  %v1670_v13 = vrot.slane %v1668_v36, 4  ;;  %1675 = vrot.lane.b32.xlu0 %v1674_v40, %s3151_s10 }
0x1fbb   :  { %v1665_v42 = vadd.f32 %v1663_v30, %v1546_v10  ;;  %v1672_v43 = vadd.f32 %v1670_v13, %v1553_v11 }
0x202b   :  { %v1676_v44 = vpop.permute.xlu0 %1675 }
0x202c   :  { %2688 = vmatmul.mubr.msk.f32.vlgmr.msra.gmra.mrb[16].mxu0 %vm243_vm5, %v1676_v44 }
0x202d   :  { %2848 = vmatpush3.bf16.msra.mxu0 %v3490_v55  ;;  %2709 = vmatprep.mubr.msk.f32.mxu0 %vm3149_vm4, %v3147_v6 }
0x202e   :  { %2849 = vmatprep.subr.bf16.mxu0 %v3148_v28 }
0x2031   :  { %2851 = vmatpush3.bf16.msra.mxu0 %v3495_v62 }
0x2032   :  { %2858 = vmatprep.subr.bf16.mxu0 %v3148_v28 }
0x20ff   :  { %v1745_v45 = vpop.f32.mrb[16].mxu0 }
0x2100   :  { %v1750_v39 = vrot.slane %v1745_v45, 2  ;;  %v2689_v46 = vpop.f32.mrb[17].mxu0 }
0x2102   :  { %v1752_v29 = vadd.f32 %v1750_v39, %v3534_v23  ;;  %v1779_v23 = vstv %s3606_s0 }
0x2104   :  { %2954 = vtanh.f32 %v1752_v29  ;;  %v1753_v48 = vmul.f32 0.5, %v1752_v29 }
0x2106   :  { %2956 = vtanh.f32 %v1753_v48 }
0x210e   :  { %v2955_v47 = vpop.eup %2954 }
0x210f   :  { %1763 = vrot.lane.b32.xlu1 %v2955_v47, %s3150_s3 }
0x2110   :  { %v2957_v49 = vpop.eup %2956 }
0x2111   :  { %v1755_v50 = vmul.f32 0.5, %v2957_v49 }
0x2113   :  { %v1756_v32 = vadd.f32 0.5, %v1755_v50 }
0x2115   :  { %v1761_v57 = vmul.f32 %v1759_v54, %v1756_v32 }
0x2181   :  { %v1764_v51 = vpop.permute.xlu1 %1763 }
0x2182   :  { %v1766_v56 = vmul.f32 %v1764_v51, %v1756_v32 }
0x2184   :  { %1768 = vrot.lane.b32.xlu0 %v1766_v56, %s3151_s10 }
0x21f6   :  { %v1769_v61 = vpop.permute.xlu0 %1768 }
0x21f7   :  { %v1771_v63 = vadd.f32 %v1769_v61, %v1761_v57 }
0x21f9   :  { %2958 = vtanh.f32 %v1771_v63  ;;  %v1875_v25 = vrot.slane %v1771_v63, 6 }
0x2203   :  { %v2959_v2 = vpop.eup %2958 }
0x2204   :  { %1774 = vrot.lane.b32.xlu1 %v2959_v2, %s3150_s3 }
0x2276   :  { %v1775_v4 = vpop.permute.xlu1 %1774 }
0x2277   :  { %v1777_v5 = vmul.f32 %v1775_v4, %v1756_v32 }
0x2279   :  { %v1780_v7 = vmul.f32 %v1779_v23, %v1777_v5  ;;  %v1787_v8 = vmul.f32 %v1786_v3, %v1777_v5  ;;  %v1793_v9 = vrot.slane %v1777_v5, 6 }
0x227b   :  { %v1782_v10 = vrot.slane %v1780_v7, 6  ;;  %v1789_v11 = vrot.slane %v1787_v8, 6  ;;  %1794 = vrot.lane.b32.xlu0 %v1793_v9, %s3151_s10 }
0x227d   :  { %v1784_v12 = vadd.f32 %v1782_v10, %v1665_v42  ;;  %v1791_v58 = vadd.f32 %v1789_v11, %v1672_v43 }
0x22ed   :  { %v1795_v14 = vpop.permute.xlu0 %1794 }
0x22ee   :  { %2699 = vmatmul.mubr.msk.f32.vlgmr.msra.gmra.mrb[16].mxu1 %vm243_vm5, %v1795_v14 }
0x22ef   :  { %2854 = vmatpush3.bf16.msra.mxu1 %v3490_v55  ;;  %2720 = vmatprep.mubr.msk.f32.mxu1 %vm3149_vm4, %v3147_v6 }
0x22f0   :  { %2855 = vmatprep.subr.bf16.mxu1 %v3148_v28 }
0x22f3   :  { %2857 = vmatpush3.bf16.msra.mxu1 %v3495_v62 }
0x22f4   :  { %2864 = vmatprep.subr.bf16.mxu1 %v3148_v28 }
0x23c1   :  { %v1864_v15 = vpop.f32.mrb[16].mxu1 }
0x23c2   :  { %v1868_v53 = vadd.f32 %v1864_v15, %v3530_v19  ;;  %v2700_v16 = vpop.f32.mrb[17].mxu1 }
0x23c4   :  { %2960 = vtanh.f32 %v1868_v53  ;;  %v1869_v20 = vmul.f32 0.5, %v1868_v53 }
0x23c6   :  { %2962 = vtanh.f32 %v1869_v20 }
0x23ce   :  { %v2961_v17 = vpop.eup %2960 }
0x23cf   :  { %1879 = vrot.lane.b32.xlu1 %v2961_v17, %s3150_s3 }
0x23d0   :  { %v2963_v21 = vpop.eup %2962 }
0x23d1   :  { %v1871_v22 = vmul.f32 0.5, %v2963_v21 }
0x23d3   :  { %v1872_v37 = vadd.f32 0.5, %v1871_v22 }
0x23d5   :  { %v1877_v26 = vmul.f32 %v1875_v25, %v1872_v37 }
0x2441   :  { %v1880_v41 = vpop.permute.xlu1 %1879 }
0x2442   :  { %v1882_v24 = vmul.f32 %v1880_v41, %v1872_v37 }
0x2444   :  { %1884 = vrot.lane.b32.xlu0 %v1882_v24, %s3151_s10 }
0x24b6   :  { %v1885_v27 = vpop.permute.xlu0 %1884 }
0x24b7   :  { %v1887_v31 = vadd.f32 %v1885_v27, %v1877_v26 }
0x24b9   :  { %2964 = vtanh.f32 %v1887_v31 }
0x24c3   :  { %v2965_v52 = vpop.eup %2964 }
0x24c4   :  { %1890 = vrot.lane.b32.xlu1 %v2965_v52, %s3150_s3 }
0x2536   :  { %v1891_v34 = vpop.permute.xlu1 %1890 }
0x2537   :  { %v1893_v35 = vmul.f32 %v1891_v34, %v1872_v37 }
0x2539   :  { %v1894_v36 = vmul.f32 %v1893_v35, %v1786_v3  ;;  %v1896_v40 = vmul.f32 %v1893_v35, %v1779_v23  ;;  %1899 = vrot.lane.b32.xlu0 %v1893_v35, %s3151_s10 }
0x253b   :  { %v1897_v30 = vadd.f32 %v1896_v40, %v1791_v58  ;;  %v1895_v13 = vadd.f32 %v1894_v36, %v1784_v12 }
0x25ab   :  { %v1900_v42 = vpop.permute.xlu0 %1899 }
0x25ac   :  { %2710 = vmatmul.mubr.msk.f32.vlgmr.msra.gmra.mrb[18].mxu0 %vm243_vm5, %v1900_v42 }
0x25ad   :  { %2860 = vmatpush3.bf16.msra.mxu0 %v3490_v55  ;;  %2731 = vmatprep.mubr.msk.f32.mxu0 %vm3149_vm4, %v3147_v6 }
0x25ae   :  { %2861 = vmatprep.subr.bf16.mxu0 %v3148_v28 }
0x25b1   :  { %2863 = vmatpush3.bf16.msra.mxu0 %v3495_v62  ;;  %v1983_v62 = vrot.slane %v1887_v31, 6 }
0x267f   :  { %v1969_v43 = vpop.f32.mrb[18].mxu0 }
0x2680   :  { %v1974_v44 = vrot.slane %v1969_v43, 6  ;;  %v2711_v45 = vpop.f32.mrb[19].mxu0 }
0x2682   :  { %v1976_v39 = vadd.f32 %v1974_v44, %v3528_v18 }
0x2684   :  { %2966 = vtanh.f32 %v1976_v39  ;;  %v1977_v29 = vmul.f32 0.5, %v1976_v39 }
0x2686   :  { %2968 = vtanh.f32 %v1977_v29 }
0x268e   :  { %v2967_v46 = vpop.eup %2966 }
0x268f   :  { %1987 = vrot.lane.b32.xlu1 %v2967_v46, %s3150_s3 }
0x2690   :  { %v2969_v55 = vpop.eup %2968 }
0x2691   :  { %v1979_v47 = vmul.f32 0.5, %v2969_v55 }
0x2693   :  { %v1980_v48 = vadd.f32 0.5, %v1979_v47 }
0x2695   :  { %v1985_v32 = vmul.f32 %v1983_v62, %v1980_v48 }
0x2701   :  { %v1988_v49 = vpop.permute.xlu1 %1987 }
0x2702   :  { %v1990_v50 = vmul.f32 %v1988_v49, %v1980_v48 }
0x2704   :  { %1992 = vrot.lane.b32.xlu0 %v1990_v50, %s3151_s10 }
0x2776   :  { %v1993_v51 = vpop.permute.xlu0 %1992 }
0x2777   :  { %v1995_v56 = vadd.f32 %v1993_v51, %v1985_v32 }
0x2779   :  { %2970 = vtanh.f32 %v1995_v56  ;;  %v2098_v17 = vrot.slane %v1995_v56, 6 }
0x2783   :  { %v2971_v54 = vpop.eup %2970 }
0x2784   :  { %1998 = vrot.lane.b32.xlu1 %v2971_v54, %s3150_s3 }
0x27f6   :  { %v1999_v57 = vpop.permute.xlu1 %1998 }
0x27f7   :  { %v2001_v61 = vmul.f32 %v1999_v57, %v1980_v48  ;;  %v2245_v48 = vld [vmem:[%s3698_s8 + $0x18] sm:$0xff] }
0x27f9   :  { %v2002_v63 = vmul.f32 %v2001_v61, %v1667_v33  ;;  %v2007_v2 = vmul.f32 %v2001_v61, %v1660_v38  ;;  %v2013_v23 = vrot.slane %v2001_v61, 2 }
0x27fb   :  { %v2004_v3 = vrot.slane %v2002_v63, 2  ;;  %v2009_v4 = vrot.slane %v2007_v2, 2  ;;  %2014 = vrot.lane.b32.xlu0 %v2013_v23, %s3151_s10  ;;  %v2243_v2 = vld [vmem:[%s3698_s8 + $0x8] sm:$0xff] }
0x27fd   :  { %v2011_v5 = vadd.f32 %v2009_v4, %v1897_v30  ;;  %v2006_v7 = vadd.f32 %v2004_v3, %v1895_v13 }
0x286d   :  { %v2015_v8 = vpop.permute.xlu0 %2014 }
0x286e   :  { %2721 = vmatmul.mubr.msk.f32.vlgmr.msra.gmra.mrb[18].mxu1 %vm243_vm5, %v2015_v8 }
0x286f   :  { %2738 = vmatprep.mubr.msk.f32.mxu1 %vm3149_vm4, %v3147_v6 }
0x2941   :  { %v2084_v9 = vpop.f32.mrb[18].mxu1 }
0x2942   :  { %v2089_v10 = vrot.slane %v2084_v9, 4  ;;  %v2722_v11 = vpop.f32.mrb[19].mxu1 }
0x2944   :  { %v2091_v33 = vadd.f32 %v2089_v10, %v3530_v19 }
0x2946   :  { %2972 = vtanh.f32 %v2091_v33  ;;  %v2092_v12 = vmul.f32 0.5, %v2091_v33 }
0x2948   :  { %2974 = vtanh.f32 %v2092_v12 }
0x2950   :  { %v2973_v38 = vpop.eup %2972 }
0x2951   :  { %2102 = vrot.lane.b32.xlu1 %v2973_v38, %s3150_s3 }
0x2952   :  { %v2975_v58 = vpop.eup %2974 }
0x2953   :  { %v2094_v14 = vmul.f32 0.5, %v2975_v58 }
0x2955   :  { %v2095_v15 = vadd.f32 0.5, %v2094_v14 }
0x2957   :  { %v2100_v20 = vmul.f32 %v2098_v17, %v2095_v15 }
0x29c3   :  { %v2103_v53 = vpop.permute.xlu1 %2102 }
0x29c4   :  { %v2105_v16 = vmul.f32 %v2103_v53, %v2095_v15 }
0x29c6   :  { %2107 = vrot.lane.b32.xlu0 %v2105_v16, %s3151_s10 }
0x2a38   :  { %v2108_v21 = vpop.permute.xlu0 %2107 }
0x2a39   :  { %v2110_v22 = vadd.f32 %v2108_v21, %v2100_v20 }
0x2a3b   :  { %2976 = vtanh.f32 %v2110_v22  ;;  %v2213_v46 = vrot.slane %v2110_v22, 6 }
0x2a45   :  { %v2977_v19 = vpop.eup %2976 }
0x2a46   :  { %2113 = vrot.lane.b32.xlu1 %v2977_v19, %s3150_s3 }
0x2ab8   :  { %v2114_v37 = vpop.permute.xlu1 %2113 }
0x2ab9   :  { %v2116_v41 = vmul.f32 %v2114_v37, %v2095_v15 }
0x2abb   :  { %v2117_v24 = vmul.f32 %v2116_v41, %v1548_v60  ;;  %v2122_v25 = vmul.f32 %v2116_v41, %v1541_v59  ;;  %v2128_v26 = vrot.slane %v2116_v41, 4 }
0x2abd   :  { %v2119_v27 = vrot.slane %v2117_v24, 4  ;;  %2129 = vrot.lane.b32.xlu0 %v2128_v26, %s3151_s10  ;;  %v2124_v31 = vrot.slane %v2122_v25, 4 }
0x2abf   :  { %v2126_v52 = vadd.f32 %v2124_v31, %v2011_v5  ;;  %v2121_v34 = vadd.f32 %v2119_v27, %v2006_v7  ;;  %v2457_v7 = vld [vmem:[#allocation12] ss:$0 sm:$0xff] }
0x2b2f   :  { %v2130_v35 = vpop.permute.xlu0 %2129 }
0x2b30   :  { %2732 = vmatmul.mubr.msk.f32.vlgmr.msra.gmra.mrb[20].mxu0 %vm243_vm5, %v2130_v35 }
0x2c03   :  { %v2199_v36 = vpop.f32.mrb[20].mxu0 }
0x2c04   :  { %v2204_v40 = vrot.slane %v2199_v36, 2  ;;  %v2733_v30 = vpop.f32.mrb[21].mxu0 }
0x2c06   :  { %v2206_v13 = vadd.f32 %v2204_v40, %v3528_v18  ;;  %v2244_v18 = vld [vmem:[%s3698_s8 + $0x10] sm:$0xff] }
0x2c07   :  { %v2865_v49 = vpack.c.bf16 %v2245_v48, %v2244_v18 }
0x2c08   :  { %2978 = vtanh.f32 %v2206_v13  ;;  %v2207_v59 = vmul.f32 0.5, %v2206_v13 }
0x2c09   :  { %2866 = vmatpush3.bf16.msra.mxu1 %v2865_v49 }
0x2c0a   :  { %2980 = vtanh.f32 %v2207_v59  ;;  %2867 = vmatprep.subr.bf16.mxu1 %v3148_v28  ;;  %v2242_v28 = vld [vmem:[%s3698_s8] sm:$0xff] }
0x2c12   :  { %v2979_v42 = vpop.eup %2978 }
0x2c13   :  { %2217 = vrot.lane.b32.xlu1 %v2979_v42, %s3150_s3 }
0x2c14   :  { %v2981_v60 = vpop.eup %2980 }
0x2c15   :  { %v2209_v43 = vmul.f32 0.5, %v2981_v60 }
0x2c17   :  { %v2210_v44 = vadd.f32 0.5, %v2209_v43 }
0x2c19   :  { %v2215_v29 = vmul.f32 %v2213_v46, %v2210_v44 }
0x2c85   :  { %v2218_v45 = vpop.permute.xlu1 %2217 }
0x2c86   :  { %v2220_v39 = vmul.f32 %v2218_v45, %v2210_v44 }
0x2c88   :  { %2222 = vrot.lane.b32.xlu0 %v2220_v39, %s3151_s10 }
0x2cfa   :  { %v2223_v55 = vpop.permute.xlu0 %2222 }
0x2cfb   :  { %v2225_v47 = vadd.f32 %v2223_v55, %v2215_v29 }
0x2cfd   :  { %2982 = vtanh.f32 %v2225_v47 }
0x2d07   :  { %v2983_v50 = vpop.eup %2982 }
0x2d08   :  { %2228 = vrot.lane.b32.xlu1 %v2983_v50, %s3150_s3 }
0x2d7a   :  { %v2229_v62 = vpop.permute.xlu1 %2228 }
0x2d7b   :  { %v2231_v32 = vmul.f32 %v2229_v62, %v2210_v44 }
0x2d7d   :  { %v2232_v51 = vmul.f32 %v2231_v32, %v1433_v1  ;;  %v2237_v56 = vmul.f32 %v2231_v32, %v1429_v0  ;;  %v2868_v1 = vpack.c.bf16 %v2243_v2, %v2242_v28 }
0x2d7f   :  { %v2234_v54 = vrot.slane %v2232_v51, 6  ;;  %v2239_v57 = vrot.slane %v2237_v56, 6 }
0x2d81   :  { %v2241_v61 = vadd.f32 %v2239_v57, %v2126_v52  ;;  %v2236_v63 = vadd.f32 %v2234_v54, %v2121_v34 }
0x2d83   :  { %2247 = vrot.lane.b32.xlu0 %v2241_v61, %s3143_s13  ;;  %2323 = vrot.lane.b32.xlu1 %v2236_v63, %s3151_s10  ;;  %s3152_s13 = smov [#allocation14]  }
0x2d84   :  { %s2413_s26 = sshll.u32 %s3152_s13, 4  ;;  %s2414_s26 = int_to_ptr.vmem [resolvable:$true] %s2413_s26 }
0x2d85   :  { %s3104_s8 = scalar_lea.vmem %s2414_s26, 32  ;;  %p3109_p2 = scmp.lt.s32.totalorder %s2414_s26, %s2414_s26 }
0x2d86   :  { %p3105_p1 = scmp.ne.s32.totalorder %s2414_s26, %s3104_s8  ;;  %p3110_p3 = scmp.lt.s32.totalorder %s3104_s8, %s3104_s8 }
0x2d88   :  { %p3111_p4 = por %p3110_p3, %p3109_p2 }
0x2d8a   :  { %p3112_p5 = pnand %p3111_p4, %p3105_p1 }
0x2df5   :  { %v2248_v23 = vpop.permute.xlu0 %2247  ;;  %v2324_v0 = vpop.permute.xlu1 %2323 }
0x2df6   :  { %2739 = vmatmul.mubr.msk.f32.vlgmr.msra.gmra.mrb[20].mxu1 %vm2249_vm14, %v2248_v23 }
0x2df7   :  { %2869 = vmatpush3.bf16.msra.mxu1 %v2868_v1  ;;  %2745 = vmatprep.mubr.msk.f32.mxu1 %vm3149_vm4, %v3147_v6 }
0x2dfa   :  { %2746 = vmatmul.mubr.msk.f32.vlgmr.msra.gmra.mrb[22].mxu1 %vm2249_vm14, %v2324_v0 }
0x2ec9   :  { %v2318_v3 = vpop.f32.mrb[20].mxu1 }
0x2eca   :  { %v2740_v4 = vpop.f32.mrb[21].mxu1 }
0x2ecd   :  { %v2393_v5 = vpop.f32.mrb[22].mxu1 }
0x2ece   :  { %v2394_v8 = vadd.f32 %v2393_v5, %v2318_v3  ;;  %v2747_v9 = vpop.f32.mrb[23].mxu1 }
0x2ed0   :  { %v2404_v10 = vadd.f32 %v2457_v7, %v2394_v8 }
0x2ed2   :  { %2406 = vst.msk [vmem:[#allocation14] sm:$0x3] %vm2405_vm15, %v2404_v10 }
0x2ed3   :  { %3115 = shalt.err (!%p3112_p5)
}
0x2ed4   :  { %s3116_s18 = scalar_lea.hbm %s3701_s11, 32 }
0x2ed5   :  { %p3117_p6 = scmp.ne.s32.totalorder %s3701_s11, %s3116_s18  ;;  %p3120_p7 = scmp.lt.u32.totalorder %s3116_s18, %s3701_s11 }
0x2ed7   :  { %p3122_p8 = pnand %p3120_p7, %p3117_p6 }
0x2ed9   :  { %3125 = shalt.err (!%p3122_p8)
}
0x2eda   :  { %2416 = dma.vmem_to_hbm [thread:$0]  %s2414_s26, 32, %s3701_s11, [#allocation5]  }
0x2edb   :  { %3134 = dma.done.wait [#allocation5], 32  }
0x2edc   :  { %3135 = vsyncadd [#allocation5], 4294967264 }
0x2edd   :  { %2420 = vsyncpa [#allocation4], 1 }
0x2ede   :  { %2421 = vsyncpa [#allocation8], 1 }
0x2edf   :  { %2422 = vsyncpa [#allocation11], 1 }
0x2ee0   :  { %2423 = vsyncpa [#allocation5], 1 }
0x2ee1   :  { %2424 = vsyncpa [#allocation6], 1 }

</bundles_post_ra>
